<compile_context>
chip_gen: v7x
topology: tpu7x:2x2x1
jax: 0.10.0
libtpu: 0.0.40
codegen_flags: <defaults>
</compile_context>

<pallas_src>
import functools

import jax
import jax.numpy as jnp
from jax.experimental import pallas as pl
from jax.experimental.pallas import tpu as pltpu


def _round_up(x, m):
    return ((x + m - 1) // m) * m


def _fast_recip(x):
    """EUP approximate reciprocal + one Newton step (avoids the VPU divide)."""
    r = pl.reciprocal(x, approx=True)
    return r * (2.0 - x * r)


def decoder_kernel(tok_ref, h0_ref, enc_ref, emb_ref,
                   w_ih_ref, w_hh_ref, b_ih_ref, b_hh_ref,
                   w_cat_h_ref, w_cat_c_ref, b_cat_ref,
                   w_out_ref, b_out_ref,
                   out_ref, hid_ref, *, L):
    t = pl.program_id(0)
    Bp, Hp = hid_ref.shape
    Vp = w_out_ref.shape[1]
    Lp = enc_ref.shape[1]

    # Initialize the VMEM-resident hidden-state carry on the first step.
    @pl.when(t == 0)
    def _():
        hid_ref[...] = h0_ref[...]

    h = hid_ref[...]                                    # (Bp, Hp) f32
    enc = enc_ref[...]                                  # (Bp, Lp, Hp) f32

    # ---- embedding lookup as a one-hot MXU matmul (table stays resident) ----
    ids = tok_ref[0]                                    # (Bp, 1) int32
    vocab_iota = jax.lax.broadcasted_iota(jnp.int32, (Bp, Vp), 1)
    onehot = (ids == vocab_iota).astype(jnp.bfloat16)   # (Bp, Vp)
    x = jnp.dot(onehot, emb_ref[...],
                preferred_element_type=jnp.float32)     # (Bp, Hp), exact bf16 rows

    # ---- GRU cell (gate order r, z, n), 128-lane-aligned gate slices --------
    gi = jnp.dot(x.astype(jnp.bfloat16), w_ih_ref[...],
                 preferred_element_type=jnp.float32) + b_ih_ref[...]
    gh = jnp.dot(h, w_hh_ref[...].astype(jnp.float32),
                 preferred_element_type=jnp.float32) + b_hh_ref[...]
    r = jax.nn.sigmoid(gi[:, 0 * Hp:1 * Hp] + gh[:, 0 * Hp:1 * Hp])
    z = jax.nn.sigmoid(gi[:, 1 * Hp:2 * Hp] + gh[:, 1 * Hp:2 * Hp])
    n = jnp.tanh(gi[:, 2 * Hp:3 * Hp] + r * gh[:, 2 * Hp:3 * Hp])
    h_new = (1.0 - z) * n + z * h                       # (Bp, Hp) == rnn_output

    # ---- dot attention: batched MXU einsums, no transposes ------------------
    scores = jnp.einsum("bqh,blh->bql", h_new[:, None, :], enc,
                        preferred_element_type=jnp.float32)[:, 0, :]  # (Bp, Lp)
    if L < Lp:  # mask zero-padded source positions (L is static)
        l_iota = jax.lax.broadcasted_iota(jnp.int32, (Bp, Lp), 1)
        scores = jnp.where(l_iota < L, scores, -1e30)
    m = jnp.max(scores, axis=1, keepdims=True)
    p = jnp.exp(scores - m)
    attn = p * _fast_recip(jnp.sum(p, axis=1, keepdims=True))          # (Bp, Lp)
    context = jnp.einsum("bql,blh->bqh", attn[:, None, :], enc,
                         preferred_element_type=jnp.float32)[:, 0, :]  # (Bp, Hp)

    # ---- concat Linear (split halves -> no lane-axis concatenate) + tanh ----
    cat = jnp.tanh(
        jnp.dot(h_new, w_cat_h_ref[...].astype(jnp.float32),
                preferred_element_type=jnp.float32)
        + jnp.dot(context, w_cat_c_ref[...].astype(jnp.float32),
                  preferred_element_type=jnp.float32)
        + b_cat_ref[...])

    # ---- output projection + softmax (padded vocab lanes carry -1e30 bias) --
    logits = jnp.dot(cat, w_out_ref[...].astype(jnp.float32),
                     preferred_element_type=jnp.float32) + b_out_ref[...]
    lm = jnp.max(logits, axis=1, keepdims=True)
    pe = jnp.exp(logits - lm)
    out_ref[0] = pe * _fast_recip(jnp.sum(pe, axis=1, keepdims=True))
    hid_ref[...] = h_new


def _prepare_params(params, Hp, Vp):
    """Pad to lane/sublane-aligned shapes, zero padding, bf16 weights."""
    H = params["w_hh"].shape[0]
    V = params["w_out"].shape[1]
    f32, bf16 = jnp.float32, jnp.bfloat16

    def pad2(x, rows, cols):
        return jnp.pad(x, ((0, rows - x.shape[0]), (0, cols - x.shape[1])))

    def pack_gru_w(w):   # (H, 3H) -> (Hp, 3Hp), each gate block 128-aligned
        gs = [pad2(w[:, g * H:(g + 1) * H], Hp, Hp) for g in range(3)]
        return jnp.concatenate(gs, axis=1).astype(bf16)

    def pack_gru_b(b):   # (1, 3H) -> (1, 3Hp)
        gs = [pad2(b[:, g * H:(g + 1) * H], 1, Hp) for g in range(3)]
        return jnp.concatenate(gs, axis=1).astype(f32)

    emb = pad2(params["embedding"], Vp, Hp).astype(bf16)
    w_ih = pack_gru_w(params["w_ih"])
    w_hh = pack_gru_w(params["w_hh"])
    b_ih = pack_gru_b(params["b_ih"])
    b_hh = pack_gru_b(params["b_hh"])
    w_cat_h = pad2(params["w_cat"][:H], Hp, Hp).astype(bf16)   # rnn_output half
    w_cat_c = pad2(params["w_cat"][H:], Hp, Hp).astype(bf16)   # context half
    b_cat = pad2(params["b_cat"], 1, Hp).astype(f32)
    w_out = pad2(params["w_out"], Hp, Vp).astype(bf16)
    # padded vocab columns get a huge negative bias so their softmax mass is 0
    b_out = jnp.full((1, Vp), -1e30, f32).at[:, :V].set(
        params["b_out"].astype(f32))
    return (emb, w_ih, w_hh, b_ih, b_hh, w_cat_h, w_cat_c, b_cat, w_out, b_out)


def luong_attn_decoder_decode(input_steps, last_hidden, encoder_outputs, params):
    """Fused T-step decode: one pallas_call, weights resident, h carried in VMEM.

    input_steps     : (T, B)   int32 token ids (one token per decode step)
    last_hidden     : (1, B, H) f32
    encoder_outputs : (L, B, H) f32
    returns (probs (T, B, V), hidden (1, B, H))
    """
    T, B = input_steps.shape
    L, _, H = encoder_outputs.shape
    V = params["w_out"].shape[1]

    Hp = _round_up(H, 128)
    Vp = _round_up(V, 128)
    Bp = _round_up(B, 8)
    Lp = _round_up(L, 8)

    (emb, w_ih, w_hh, b_ih, b_hh,
     w_cat_h, w_cat_c, b_cat, w_out, b_out) = _prepare_params(params, Hp, Vp)

    tok = jnp.zeros((T, Bp, 1), jnp.int32).at[:, :B, 0].set(input_steps)
    h0 = jnp.zeros((Bp, Hp), jnp.float32).at[:B, :H].set(last_hidden[0])
    enc = jnp.zeros((Bp, Lp, Hp), jnp.float32).at[:B, :L, :H].set(
        jnp.transpose(encoder_outputs, (1, 0, 2)))

    const2 = lambda t: (0, 0)
    in_specs = [
        pl.BlockSpec((1, Bp, 1), lambda t: (t, 0, 0)),      # token ids (per step)
        pl.BlockSpec((Bp, Hp), const2),                     # h0
        pl.BlockSpec((Bp, Lp, Hp), lambda t: (0, 0, 0)),    # encoder outputs
        pl.BlockSpec((Vp, Hp), const2),                     # embedding table
        pl.BlockSpec((Hp, 3 * Hp), const2),                 # w_ih
        pl.BlockSpec((Hp, 3 * Hp), const2),                 # w_hh
        pl.BlockSpec((1, 3 * Hp), const2),                  # b_ih
        pl.BlockSpec((1, 3 * Hp), const2),                  # b_hh
        pl.BlockSpec((Hp, Hp), const2),                     # w_cat (rnn half)
        pl.BlockSpec((Hp, Hp), const2),                     # w_cat (ctx half)
        pl.BlockSpec((1, Hp), const2),                      # b_cat
        pl.BlockSpec((Hp, Vp), const2),                     # w_out
        pl.BlockSpec((1, Vp), const2),                      # b_out
    ]
    out_specs = (
        pl.BlockSpec((1, Bp, Vp), lambda t: (t, 0, 0)),     # per-step probs
        pl.BlockSpec((Bp, Hp), const2),                     # hidden carry/final
    )

    probs_p, hid_p = pl.pallas_call(
        functools.partial(decoder_kernel, L=L),
        out_shape=(jax.ShapeDtypeStruct((T, Bp, Vp), jnp.float32),
                   jax.ShapeDtypeStruct((Bp, Hp), jnp.float32)),
        grid_spec=pltpu.PrefetchScalarGridSpec(
            num_scalar_prefetch=0,
            grid=(T,),
            in_specs=in_specs,
            out_specs=out_specs),
        compiler_params=pltpu.CompilerParams(
            dimension_semantics=("arbitrary",),      # sequential carry over time
            vmem_limit_bytes=64 * 1024 * 1024),
    )(tok, h0, enc, emb, w_ih, w_hh, b_ih, b_hh,
      w_cat_h, w_cat_c, b_cat, w_out, b_out)

    return probs_p[:, :B, :V], hid_p[:B, :H][None]


def luong_attn_decoder_forward(input_step, last_hidden, encoder_outputs, params):
    """Single-step forward, matching LuongAttnDecoderRNN.forward exactly."""
    probs, hidden = luong_attn_decoder_decode(input_step, last_hidden,
                                              encoder_outputs, params)
    return probs[0], hidden                              # (B, V), (1, B, H)


def reference_forward(input_step, last_hidden, encoder_outputs, params):
    """Pure-JAX reference (weights quantized to bf16 like the kernel)."""
    q = lambda w: w.astype(jnp.bfloat16).astype(jnp.float32)
    H = params["w_hh"].shape[0]
    x = q(params["embedding"])[input_step[0]]
    h = last_hidden[0]
    gi = x @ q(params["w_ih"]) + params["b_ih"]
    gh = h @ q(params["w_hh"]) + params["b_hh"]
    r = jax.nn.sigmoid(gi[:, :H] + gh[:, :H])
    z = jax.nn.sigmoid(gi[:, H:2 * H] + gh[:, H:2 * H])
    n = jnp.tanh(gi[:, 2 * H:] + r * gh[:, 2 * H:])
    h_new = (1 - z) * n + z * h
    scores = jnp.sum(h_new[None] * encoder_outputs, axis=2)      # (L, B)
    attn = jax.nn.softmax(scores.T, axis=1)                      # (B, L)
    context = jnp.einsum("bl,lbh->bh", attn, encoder_outputs)
    cat = jnp.tanh(jnp.concatenate([h_new, context], 1) @ q(params["w_cat"])
                   + params["b_cat"])
    out = jax.nn.softmax(cat @ q(params["w_out"]) + params["b_out"], axis=1)
    return out, h_new[None]


if __name__ == "__main__":
    B, H, L, V, T = 2, 32, 8, 40, 4   # batch, hidden, src len, vocab, decode steps

    key = jax.random.PRNGKey(0)
    ks = jax.random.split(key, 12)
    s = 0.1
    params = {
        "embedding": s * jax.random.normal(ks[0], (V, H), jnp.float32),
        # GRU weights stored transposed (in_features, 3*H) so kernel does x @ W
        "w_ih":  s * jax.random.normal(ks[1], (H, 3 * H), jnp.float32),
        "w_hh":  s * jax.random.normal(ks[2], (H, 3 * H), jnp.float32),
        "b_ih":  s * jax.random.normal(ks[3], (1, 3 * H), jnp.float32),
        "b_hh":  s * jax.random.normal(ks[4], (1, 3 * H), jnp.float32),
        "w_cat": s * jax.random.normal(ks[5], (2 * H, H), jnp.float32),
        "b_cat": s * jax.random.normal(ks[6], (1, H), jnp.float32),
        "w_out": s * jax.random.normal(ks[7], (H, V), jnp.float32),
        "b_out": s * jax.random.normal(ks[8], (1, V), jnp.float32),
    }

    input_steps = jax.random.randint(ks[9], (T, B), 0, V, dtype=jnp.int32)
    last_hidden = s * jax.random.normal(ks[10], (1, B, H), jnp.float32)
    encoder_outputs = s * jax.random.normal(ks[11], (L, B, H), jnp.float32)

    # ---- single-step forward (matches the PyTorch module's forward) ---------
    out1, hid1 = luong_attn_decoder_forward(input_steps[:1], last_hidden,
                                            encoder_outputs, params)
    jax.block_until_ready((out1, hid1))
    ref_out1, ref_hid1 = reference_forward(input_steps[:1], last_hidden,
                                           encoder_outputs, params)
    assert out1.shape == (B, V) and hid1.shape == (1, B, H)
    assert jnp.allclose(out1, ref_out1, atol=3e-4, rtol=3e-4)
    assert jnp.allclose(hid1, ref_hid1, atol=3e-4, rtol=3e-4)
    assert jnp.allclose(jnp.sum(out1, axis=1), 1.0, atol=1e-3)

    # ---- fused T-step decode (one pallas_call, weights stay resident) -------
    outs, hidT = luong_attn_decoder_decode(input_steps, last_hidden,
                                           encoder_outputs, params)
    jax.block_until_ready((outs, hidT))
    assert outs.shape == (T, B, V) and hidT.shape == (1, B, H)
    ref_h = last_hidden
    for t in range(T):
        ref_o, ref_h = reference_forward(input_steps[t:t + 1], ref_h,
                                         encoder_outputs, params)
        assert jnp.allclose(outs[t], ref_o, atol=1e-3, rtol=1e-3)
    assert jnp.allclose(hidT, ref_h, atol=1e-3, rtol=1e-3)

    print("KERNEL_OK")
</pallas_src>

<mosaic_0001>
module attributes {stable_mosaic.version = 11 : i64} {
  func.func @decoder_kernel(%arg0: i32, %arg1: memref<1x8x1xi32, #tpu.memory_space<vmem>>, %arg2: memref<8x128xf32, #tpu.memory_space<vmem>>, %arg3: memref<8x8x128xf32, #tpu.memory_space<vmem>>, %arg4: memref<128x128xbf16, #tpu.memory_space<vmem>>, %arg5: memref<128x384xbf16, #tpu.memory_space<vmem>>, %arg6: memref<128x384xbf16, #tpu.memory_space<vmem>>, %arg7: memref<1x384xf32, #tpu.memory_space<vmem>>, %arg8: memref<1x384xf32, #tpu.memory_space<vmem>>, %arg9: memref<128x128xbf16, #tpu.memory_space<vmem>>, %arg10: memref<128x128xbf16, #tpu.memory_space<vmem>>, %arg11: memref<1x128xf32, #tpu.memory_space<vmem>>, %arg12: memref<128x128xbf16, #tpu.memory_space<vmem>>, %arg13: memref<1x128xf32, #tpu.memory_space<vmem>>, %arg14: memref<1x8x128xf32, #tpu.memory_space<vmem>>, %arg15: memref<8x128xf32, #tpu.memory_space<vmem>>) attributes {dimension_semantics = [#tpu.dimension_semantics<arbitrary>], iteration_bounds = array<i64: 1>, scalar_prefetch = 0 : i64, scratch_operands = 0 : i64, tpu.core_type = #tpu.core_type<tc>, window_params = [{transform_indices = @transform_0, window_bounds = array<i64: 1, 8, 1>}, {pipeline_mode = #tpu.pipeline_mode<synchronous>, transform_indices = @transform_1, window_bounds = array<i64: 8, 128>}, {pipeline_mode = #tpu.pipeline_mode<synchronous>, transform_indices = @transform_2, window_bounds = array<i64: 8, 8, 128>}, {pipeline_mode = #tpu.pipeline_mode<synchronous>, transform_indices = @transform_3, window_bounds = array<i64: 128, 128>}, {pipeline_mode = #tpu.pipeline_mode<synchronous>, transform_indices = @transform_4, window_bounds = array<i64: 128, 384>}, {pipeline_mode = #tpu.pipeline_mode<synchronous>, transform_indices = @transform_5, window_bounds = array<i64: 128, 384>}, {pipeline_mode = #tpu.pipeline_mode<synchronous>, transform_indices = @transform_6, window_bounds = array<i64: 1, 384>}, {pipeline_mode = #tpu.pipeline_mode<synchronous>, transform_indices = @transform_7, window_bounds = array<i64: 1, 384>}, {pipeline_mode = #tpu.pipeline_mode<synchronous>, transform_indices = @transform_8, window_bounds = array<i64: 128, 128>}, {pipeline_mode = #tpu.pipeline_mode<synchronous>, transform_indices = @transform_9, window_bounds = array<i64: 128, 128>}, {pipeline_mode = #tpu.pipeline_mode<synchronous>, transform_indices = @transform_10, window_bounds = array<i64: 1, 128>}, {pipeline_mode = #tpu.pipeline_mode<synchronous>, transform_indices = @transform_11, window_bounds = array<i64: 128, 128>}, {pipeline_mode = #tpu.pipeline_mode<synchronous>, transform_indices = @transform_12, window_bounds = array<i64: 1, 128>}, {transform_indices = @transform_13, window_bounds = array<i64: 1, 8, 128>}, {pipeline_mode = #tpu.pipeline_mode<synchronous>, transform_indices = @transform_14, window_bounds = array<i64: 8, 128>}]} {
    %c0_i32 = arith.constant 0 : i32
    %0 = arith.cmpi eq, %arg0, %c0_i32 : i32
    %1 = arith.extui %0 : i1 to i32
    %c0_i32_0 = arith.constant 0 : i32
    %2 = arith.cmpi ne, %1, %c0_i32_0 : i32
    scf.if %2 {
      %c0_49 = arith.constant 0 : index
      %c0_50 = arith.constant 0 : index
      %108 = vector.load %arg2[%c0_49, %c0_50] : memref<8x128xf32, #tpu.memory_space<vmem>>, vector<8x128xf32>
      %c0_51 = arith.constant 0 : index
      %c0_52 = arith.constant 0 : index
      %109 = vector.load %arg15[%c0_51, %c0_52] : memref<8x128xf32, #tpu.memory_space<vmem>>, vector<8x128xf32>
      tpu.vector_store %arg15[%c0_51, %c0_52], %108 {strides = array<i32>} : memref<8x128xf32, #tpu.memory_space<vmem>>, vector<8x128xf32>,
    } else {
    }
    %c0 = arith.constant 0 : index
    %c0_1 = arith.constant 0 : index
    %3 = vector.load %arg15[%c0, %c0_1] : memref<8x128xf32, #tpu.memory_space<vmem>>, vector<8x128xf32>
    %c0_2 = arith.constant 0 : index
    %c0_3 = arith.constant 0 : index
    %c0_4 = arith.constant 0 : index
    %4 = vector.load %arg3[%c0_2, %c0_3, %c0_4] : memref<8x8x128xf32, #tpu.memory_space<vmem>>, vector<8x8x128xf32>
    %c0_5 = arith.constant 0 : index
    %c0_6 = arith.constant 0 : index
    %c0_7 = arith.constant 0 : index
    %5 = vector.load %arg1[%c0_5, %c0_6, %c0_7] : memref<1x8x1xi32, #tpu.memory_space<vmem>>, vector<1x8x1xi32>
    %6 = vector.shape_cast %5 : vector<1x8x1xi32> to vector<8x1xi32>
    %7 = tpu.iota {dimensions = array<i32: 1>} : vector<8x128xi32>
    %8 = vector.broadcast %6 : vector<8x1xi32> to vector<8x128xi32>
    %9 = arith.cmpi eq, %8, %7 : vector<8x128xi32>
    %10 = arith.extui %9 : vector<8x128xi1> to vector<8x128xi32>
    %11 = arith.sitofp %10 : vector<8x128xi32> to vector<8x128xf32>
    %12 = arith.truncf %11 : vector<8x128xf32> to vector<8x128xbf16>
    %c0_8 = arith.constant 0 : index
    %c0_9 = arith.constant 0 : index
    %13 = vector.load %arg4[%c0_8, %c0_9] : memref<128x128xbf16, #tpu.memory_space<vmem>>, vector<128x128xbf16>
    %cst = arith.constant dense<0.000000e+00> : vector<8x128xf32>
    %14 = tpu.matmul %12, %13, %cst {dimension_numbers = #tpu.dot_dimension_numbers<[1], [0], [0], [1], [0, 0, 1, 1], [], []>} : vector<8x128xbf16>, vector<128x128xbf16>, vector<8x128xf32> -> vector<8x128xf32>
    %15 = arith.truncf %14 : vector<8x128xf32> to vector<8x128xbf16>
    %c0_10 = arith.constant 0 : index
    %c0_11 = arith.constant 0 : index
    %16 = vector.load %arg5[%c0_10, %c0_11] : memref<128x384xbf16, #tpu.memory_space<vmem>>, vector<128x384xbf16>
    %cst_12 = arith.constant dense<0.000000e+00> : vector<8x384xf32>
    %17 = tpu.matmul %15, %16, %cst_12 {dimension_numbers = #tpu.dot_dimension_numbers<[1], [0], [0], [1], [0, 0, 1, 1], [], []>} : vector<8x128xbf16>, vector<128x384xbf16>, vector<8x384xf32> -> vector<8x384xf32>
    %c0_13 = arith.constant 0 : index
    %c0_14 = arith.constant 0 : index
    %18 = vector.load %arg7[%c0_13, %c0_14] : memref<1x384xf32, #tpu.memory_space<vmem>>, vector<1x384xf32>
    %19 = vector.broadcast %18 : vector<1x384xf32> to vector<8x384xf32>
    %20 = arith.addf %17, %19 : vector<8x384xf32>
    %c0_15 = arith.constant 0 : index
    %c0_16 = arith.constant 0 : index
    %21 = vector.load %arg6[%c0_15, %c0_16] : memref<128x384xbf16, #tpu.memory_space<vmem>>, vector<128x384xbf16>
    %22 = arith.extf %21 : vector<128x384xbf16> to vector<128x384xf32>
    %cst_17 = arith.constant dense<0.000000e+00> : vector<8x384xf32>
    %23 = tpu.matmul %3, %22, %cst_17 {dimension_numbers = #tpu.dot_dimension_numbers<[1], [0], [0], [1], [0, 0, 1, 1], [], []>} : vector<8x128xf32>, vector<128x384xf32>, vector<8x384xf32> -> vector<8x384xf32>
    %c0_18 = arith.constant 0 : index
    %c0_19 = arith.constant 0 : index
    %24 = vector.load %arg8[%c0_18, %c0_19] : memref<1x384xf32, #tpu.memory_space<vmem>>, vector<1x384xf32>
    %25 = vector.broadcast %24 : vector<1x384xf32> to vector<8x384xf32>
    %26 = arith.addf %23, %25 : vector<8x384xf32>
    %27 = vector.extract_strided_slice %20 {offsets = [0, 0], sizes = [8, 128], strides = [1, 1]} : vector<8x384xf32> to vector<8x128xf32>
    %28 = vector.extract_strided_slice %26 {offsets = [0, 0], sizes = [8, 128], strides = [1, 1]} : vector<8x384xf32> to vector<8x128xf32>
    %29 = arith.addf %27, %28 : vector<8x128xf32>
    %30 = arith.negf %29 : vector<8x128xf32>
    %31 = math.exp %30 : vector<8x128xf32>
    %cst_20 = arith.constant 1.000000e+00 : f32
    %32 = vector.broadcast %cst_20 : f32 to vector<8x128xf32>
    %33 = arith.addf %32, %31 : vector<8x128xf32>
    %34 = arith.divf %32, %33 : vector<8x128xf32>
    %35 = vector.extract_strided_slice %20 {offsets = [0, 128], sizes = [8, 128], strides = [1, 1]} : vector<8x384xf32> to vector<8x128xf32>
    %36 = vector.extract_strided_slice %26 {offsets = [0, 128], sizes = [8, 128], strides = [1, 1]} : vector<8x384xf32> to vector<8x128xf32>
    %37 = arith.addf %35, %36 : vector<8x128xf32>
    %38 = arith.negf %37 : vector<8x128xf32>
    %39 = math.exp %38 : vector<8x128xf32>
    %cst_21 = arith.constant 1.000000e+00 : f32
    %40 = vector.broadcast %cst_21 : f32 to vector<8x128xf32>
    %41 = arith.addf %40, %39 : vector<8x128xf32>
    %42 = arith.divf %40, %41 : vector<8x128xf32>
    %43 = vector.extract_strided_slice %20 {offsets = [0, 256], sizes = [8, 128], strides = [1, 1]} : vector<8x384xf32> to vector<8x128xf32>
    %44 = vector.extract_strided_slice %26 {offsets = [0, 256], sizes = [8, 128], strides = [1, 1]} : vector<8x384xf32> to vector<8x128xf32>
    %45 = arith.mulf %34, %44 : vector<8x128xf32>
    %46 = arith.addf %43, %45 : vector<8x128xf32>
    %47 = math.tanh %46 : vector<8x128xf32>
    %cst_22 = arith.constant 1.000000e+00 : f32
    %48 = vector.broadcast %cst_22 : f32 to vector<8x128xf32>
    %49 = arith.subf %48, %42 : vector<8x128xf32>
    %50 = arith.mulf %49, %47 : vector<8x128xf32>
    %51 = arith.mulf %42, %3 : vector<8x128xf32>
    %52 = arith.addf %50, %51 : vector<8x128xf32>
    %53 = vector.shape_cast %52 : vector<8x128xf32> to vector<8x1x128xf32>
    "tpu.trace_start"() <{level = 10 : i32, message = "bqh,blh->bql"}> : () -> ()
    %cst_23 = arith.constant dense<0.000000e+00> : vector<8x1x8xf32>
    %54 = tpu.matmul %53, %4, %cst_23 {dimension_numbers = #tpu.dot_dimension_numbers<[2], [2], [1], [1], [0, 0, 0, 1, 1, 1], [0], [0]>} : vector<8x1x128xf32>, vector<8x8x128xf32>, vector<8x1x8xf32> -> vector<8x1x8xf32>
    "tpu.trace_stop"() : () -> ()
    %55 = vector.shape_cast %54 : vector<8x1x8xf32> to vector<8x8xf32>
    %cst_24 = arith.constant dense<0xFF800000> : vector<8xf32>
    %56 = vector.multi_reduction <maximumf>, %55, %cst_24 [1] : vector<8x8xf32> to vector<8xf32>
    %57 = vector.shape_cast %56 : vector<8xf32> to vector<8x1xf32>
    %58 = vector.broadcast %57 : vector<8x1xf32> to vector<8x8xf32>
    %59 = arith.subf %55, %58 : vector<8x8xf32>
    %60 = math.exp %59 : vector<8x8xf32>
    %cst_25 = arith.constant dense<0.000000e+00> : vector<8xf32>
    %61 = vector.multi_reduction <add>, %60, %cst_25 [1] : vector<8x8xf32> to vector<8xf32>
    %62 = vector.shape_cast %61 : vector<8xf32> to vector<8x1xf32>
    %63 = tpu.reciprocal %62 {approx = true} : vector<8x1xf32> -> vector<8x1xf32>
    %64 = arith.mulf %62, %63 : vector<8x1xf32>
    %cst_26 = arith.constant 2.000000e+00 : f32
    %65 = vector.broadcast %cst_26 : f32 to vector<8x1xf32>
    %66 = arith.subf %65, %64 : vector<8x1xf32>
    %67 = arith.mulf %63, %66 : vector<8x1xf32>
    %68 = vector.broadcast %67 : vector<8x1xf32> to vector<8x8xf32>
    %69 = arith.mulf %60, %68 : vector<8x8xf32>
    %70 = vector.shape_cast %69 : vector<8x8xf32> to vector<8x1x8xf32>
    "tpu.trace_start"() <{level = 10 : i32, message = "bql,blh->bqh"}> : () -> ()
    %cst_27 = arith.constant dense<0.000000e+00> : vector<8x1x128xf32>
    %71 = tpu.matmul %70, %4, %cst_27 {dimension_numbers = #tpu.dot_dimension_numbers<[2], [1], [1], [2], [0, 0, 0, 1, 1, 2], [0], [0]>} : vector<8x1x8xf32>, vector<8x8x128xf32>, vector<8x1x128xf32> -> vector<8x1x128xf32>
    "tpu.trace_stop"() : () -> ()
    %72 = vector.shape_cast %71 : vector<8x1x128xf32> to vector<8x128xf32>
    %c0_28 = arith.constant 0 : index
    %c0_29 = arith.constant 0 : index
    %73 = vector.load %arg9[%c0_28, %c0_29] : memref<128x128xbf16, #tpu.memory_space<vmem>>, vector<128x128xbf16>
    %74 = arith.extf %73 : vector<128x128xbf16> to vector<128x128xf32>
    %cst_30 = arith.constant dense<0.000000e+00> : vector<8x128xf32>
    %75 = tpu.matmul %52, %74, %cst_30 {dimension_numbers = #tpu.dot_dimension_numbers<[1], [0], [0], [1], [0, 0, 1, 1], [], []>} : vector<8x128xf32>, vector<128x128xf32>, vector<8x128xf32> -> vector<8x128xf32>
    %c0_31 = arith.constant 0 : index
    %c0_32 = arith.constant 0 : index
    %76 = vector.load %arg10[%c0_31, %c0_32] : memref<128x128xbf16, #tpu.memory_space<vmem>>, vector<128x128xbf16>
    %77 = arith.extf %76 : vector<128x128xbf16> to vector<128x128xf32>
    %cst_33 = arith.constant dense<0.000000e+00> : vector<8x128xf32>
    %78 = tpu.matmul %72, %77, %cst_33 {dimension_numbers = #tpu.dot_dimension_numbers<[1], [0], [0], [1], [0, 0, 1, 1], [], []>} : vector<8x128xf32>, vector<128x128xf32>, vector<8x128xf32> -> vector<8x128xf32>
    %79 = arith.addf %75, %78 : vector<8x128xf32>
    %c0_34 = arith.constant 0 : index
    %c0_35 = arith.constant 0 : index
    %80 = vector.load %arg11[%c0_34, %c0_35] : memref<1x128xf32, #tpu.memory_space<vmem>>, vector<1x128xf32>
    %81 = vector.broadcast %80 : vector<1x128xf32> to vector<8x128xf32>
    %82 = arith.addf %79, %81 : vector<8x128xf32>
    %83 = math.tanh %82 : vector<8x128xf32>
    %c0_36 = arith.constant 0 : index
    %c0_37 = arith.constant 0 : index
    %84 = vector.load %arg12[%c0_36, %c0_37] : memref<128x128xbf16, #tpu.memory_space<vmem>>, vector<128x128xbf16>
    %85 = arith.extf %84 : vector<128x128xbf16> to vector<128x128xf32>
    %cst_38 = arith.constant dense<0.000000e+00> : vector<8x128xf32>
    %86 = tpu.matmul %83, %85, %cst_38 {dimension_numbers = #tpu.dot_dimension_numbers<[1], [0], [0], [1], [0, 0, 1, 1], [], []>} : vector<8x128xf32>, vector<128x128xf32>, vector<8x128xf32> -> vector<8x128xf32>
    %c0_39 = arith.constant 0 : index
    %c0_40 = arith.constant 0 : index
    %87 = vector.load %arg13[%c0_39, %c0_40] : memref<1x128xf32, #tpu.memory_space<vmem>>, vector<1x128xf32>
    %88 = vector.broadcast %87 : vector<1x128xf32> to vector<8x128xf32>
    %89 = arith.addf %86, %88 : vector<8x128xf32>
    %cst_41 = arith.constant dense<0xFF800000> : vector<8xf32>
    %90 = vector.multi_reduction <maximumf>, %89, %cst_41 [1] : vector<8x128xf32> to vector<8xf32>
    %91 = vector.shape_cast %90 : vector<8xf32> to vector<8x1xf32>
    %92 = vector.broadcast %91 : vector<8x1xf32> to vector<8x128xf32>
    %93 = arith.subf %89, %92 : vector<8x128xf32>
    %94 = math.exp %93 : vector<8x128xf32>
    %cst_42 = arith.constant dense<0.000000e+00> : vector<8xf32>
    %95 = vector.multi_reduction <add>, %94, %cst_42 [1] : vector<8x128xf32> to vector<8xf32>
    %96 = vector.shape_cast %95 : vector<8xf32> to vector<8x1xf32>
    %97 = tpu.reciprocal %96 {approx = true} : vector<8x1xf32> -> vector<8x1xf32>
    %98 = arith.mulf %96, %97 : vector<8x1xf32>
    %cst_43 = arith.constant 2.000000e+00 : f32
    %99 = vector.broadcast %cst_43 : f32 to vector<8x1xf32>
    %100 = arith.subf %99, %98 : vector<8x1xf32>
    %101 = arith.mulf %97, %100 : vector<8x1xf32>
    %102 = vector.broadcast %101 : vector<8x1xf32> to vector<8x128xf32>
    %103 = arith.mulf %94, %102 : vector<8x128xf32>
    %c0_44 = arith.constant 0 : index
    %c0_45 = arith.constant 0 : index
    %c0_46 = arith.constant 0 : index
    %104 = vector.load %arg14[%c0_44, %c0_45, %c0_46] : memref<1x8x128xf32, #tpu.memory_space<vmem>>, vector<1x8x128xf32>
    %105 = vector.shape_cast %104 : vector<1x8x128xf32> to vector<8x128xf32>
    %106 = vector.shape_cast %103 : vector<8x128xf32> to vector<1x8x128xf32>
    tpu.vector_store %arg14[%c0_44, %c0_45, %c0_46], %106 {strides = array<i32>} : memref<1x8x128xf32, #tpu.memory_space<vmem>>, vector<1x8x128xf32>,
    %c0_47 = arith.constant 0 : index
    %c0_48 = arith.constant 0 : index
    %107 = vector.load %arg15[%c0_47, %c0_48] : memref<8x128xf32, #tpu.memory_space<vmem>>, vector<8x128xf32>
    tpu.vector_store %arg15[%c0_47, %c0_48], %52 {strides = array<i32>} : memref<8x128xf32, #tpu.memory_space<vmem>>, vector<8x128xf32>,
    return
  }
  func.func @transform_0(%arg0: i32) -> (i32, i32, i32) {
    %c0_i32 = arith.constant 0 : i32
    %c0_i32_0 = arith.constant 0 : i32
    %c0_i32_1 = arith.constant 0 : i32
    return %arg0, %c0_i32, %c0_i32_0 : i32, i32, i32
  }
  func.func @transform_1(%arg0: i32) -> (i32, i32) {
    %c0_i32 = arith.constant 0 : i32
    %c0_i32_0 = arith.constant 0 : i32
    %c0_i32_1 = arith.constant 0 : i32
    return %c0_i32, %c0_i32_0 : i32, i32
  }
  func.func @transform_2(%arg0: i32) -> (i32, i32, i32) {
    %c0_i32 = arith.constant 0 : i32
    %c0_i32_0 = arith.constant 0 : i32
    %c0_i32_1 = arith.constant 0 : i32
    %c0_i32_2 = arith.constant 0 : i32
    return %c0_i32, %c0_i32_0, %c0_i32_1 : i32, i32, i32
  }
  func.func @transform_3(%arg0: i32) -> (i32, i32) {
    %c0_i32 = arith.constant 0 : i32
    %c0_i32_0 = arith.constant 0 : i32
    %c0_i32_1 = arith.constant 0 : i32
    return %c0_i32, %c0_i32_0 : i32, i32
  }
  func.func @transform_4(%arg0: i32) -> (i32, i32) {
    %c0_i32 = arith.constant 0 : i32
    %c0_i32_0 = arith.constant 0 : i32
    %c0_i32_1 = arith.constant 0 : i32
    return %c0_i32, %c0_i32_0 : i32, i32
  }
  func.func @transform_5(%arg0: i32) -> (i32, i32) {
    %c0_i32 = arith.constant 0 : i32
    %c0_i32_0 = arith.constant 0 : i32
    %c0_i32_1 = arith.constant 0 : i32
    return %c0_i32, %c0_i32_0 : i32, i32
  }
  func.func @transform_6(%arg0: i32) -> (i32, i32) {
    %c0_i32 = arith.constant 0 : i32
    %c0_i32_0 = arith.constant 0 : i32
    %c0_i32_1 = arith.constant 0 : i32
    return %c0_i32, %c0_i32_0 : i32, i32
  }
  func.func @transform_7(%arg0: i32) -> (i32, i32) {
    %c0_i32 = arith.constant 0 : i32
    %c0_i32_0 = arith.constant 0 : i32
    %c0_i32_1 = arith.constant 0 : i32
    return %c0_i32, %c0_i32_0 : i32, i32
  }
  func.func @transform_8(%arg0: i32) -> (i32, i32) {
    %c0_i32 = arith.constant 0 : i32
    %c0_i32_0 = arith.constant 0 : i32
    %c0_i32_1 = arith.constant 0 : i32
    return %c0_i32, %c0_i32_0 : i32, i32
  }
  func.func @transform_9(%arg0: i32) -> (i32, i32) {
    %c0_i32 = arith.constant 0 : i32
    %c0_i32_0 = arith.constant 0 : i32
    %c0_i32_1 = arith.constant 0 : i32
    return %c0_i32, %c0_i32_0 : i32, i32
  }
  func.func @transform_10(%arg0: i32) -> (i32, i32) {
    %c0_i32 = arith.constant 0 : i32
    %c0_i32_0 = arith.constant 0 : i32
    %c0_i32_1 = arith.constant 0 : i32
    return %c0_i32, %c0_i32_0 : i32, i32
  }
  func.func @transform_11(%arg0: i32) -> (i32, i32) {
    %c0_i32 = arith.constant 0 : i32
    %c0_i32_0 = arith.constant 0 : i32
    %c0_i32_1 = arith.constant 0 : i32
    return %c0_i32, %c0_i32_0 : i32, i32
  }
  func.func @transform_12(%arg0: i32) -> (i32, i32) {
    %c0_i32 = arith.constant 0 : i32
    %c0_i32_0 = arith.constant 0 : i32
    %c0_i32_1 = arith.constant 0 : i32
    return %c0_i32, %c0_i32_0 : i32, i32
  }
  func.func @transform_13(%arg0: i32) -> (i32, i32, i32) {
    %c0_i32 = arith.constant 0 : i32
    %c0_i32_0 = arith.constant 0 : i32
    %c0_i32_1 = arith.constant 0 : i32
    return %arg0, %c0_i32, %c0_i32_0 : i32, i32, i32
  }
  func.func @transform_14(%arg0: i32) -> (i32, i32) {
    %c0_i32 = arith.constant 0 : i32
    %c0_i32_0 = arith.constant 0 : i32
    %c0_i32_1 = arith.constant 0 : i32
    return %c0_i32, %c0_i32_0 : i32, i32
  }
}

</mosaic_0001>

<bundles_post_ra>
// kernel: tpu_custom_call.1
= control target key start
LH: loop header
LB: loop body
LE: loop exit
PB: predicated region body
PF: predicated region fallthrough
CT: control target
= control target key end

     0   :  { %20 = vsyncpa [#allocation3], 0  ;;  %s4275_s0 = inlined_call_operand.hbm [shape: s32[1,8,1], index: 0, kind: input, shape index: {}]   ;;  %s4276_s1 = inlined_call_operand.hbm [shape: f32[8,128], index: 1, kind: input, shape index: {}]   ;;  %s4277_s2 = inlined_call_operand.hbm [shape: f32[8,8,128], index: 2, kind: input, shape index: {}]   ;;  %s4278_s3 = inlined_call_operand.hbm [shape: bf16[128,128], index: 3, kind: input, shape index: {}]   ;;  %s4279_s4 = inlined_call_operand.hbm [shape: bf16[128,384], index: 4, kind: input, shape index: {}]   ;;  %s4280_s5 = inlined_call_operand.hbm [shape: bf16[128,384], index: 5, kind: input, shape index: {}]   ;;  %s4281_s6 = inlined_call_operand.hbm [shape: f32[1,384], index: 6, kind: input, shape index: {}]   ;;  %s4282_s7 = inlined_call_operand.hbm [shape: f32[1,384], index: 7, kind: input, shape index: {}]   ;;  %s4283_s8 = inlined_call_operand.hbm [shape: bf16[128,128], index: 8, kind: input, shape index: {}]   ;;  %s4284_s9 = inlined_call_operand.hbm [shape: bf16[128,128], index: 9, kind: input, shape index: {}]   ;;  %s4285_s10 = inlined_call_operand.hbm [shape: f32[1,128], index: 10, kind: input, shape index: {}]   ;;  %s4286_s11 = inlined_call_operand.hbm [shape: bf16[128,128], index: 11, kind: input, shape index: {}]   ;;  %s4287_s12 = inlined_call_operand.hbm [shape: f32[1,128], index: 12, kind: input, shape index: {}]   ;;  %s4288_s13 = inlined_call_operand.hbm [shape: f32[1,8,128], index: 13, kind: output, shape index: {0}]   ;;  %s4289_s14 = inlined_call_operand.hbm [shape: f32[8,128], index: 14, kind: output, shape index: {1}]  }
   0x1   :  { %21 = vsyncpa [#allocation6], 0 }
   0x2   :  { %22 = vsyncpa [#allocation9], 0 }
   0x3   :  { %23 = vsyncpa [#allocation12], 0 }
   0x4   :  { %24 = vsyncpa [#allocation15], 0 }
   0x5   :  { %25 = vsyncpa [#allocation18], 0 }
   0x6   :  { %26 = vsyncpa [#allocation21], 0 }
   0x7   :  { %27 = vsyncpa [#allocation4], 0 }
   0x8   :  { %28 = vsyncpa [#allocation25], 0  ;;  %s3760_s29 = smov [#allocation5]   ;;  %s3761_s15 = smov [#allocation8]  }
   0x9   :  { %s45_s30 = sshll.u32 %s3760_s29, 4  ;;  %s66_s16 = sshll.u32 %s3761_s15, 4  ;;  %s46_s30 = int_to_ptr.vmem [resolvable:$true] %s45_s30  ;;  %s3862_s16 = int_to_ptr.vmem [resolvable:$true] %s66_s16 }
   0xa   :  { %s3412_s19 = scalar_lea.hbm %s4276_s1, 128 }
   0xb   :  { %p3413_p0 = scmp.ne.s32.totalorder %s4276_s1, %s3412_s19  ;;  %p3416_p1 = scmp.lt.u32.totalorder %s3412_s19, %s4276_s1 }
   0xd   :  { %p3418_p2 = pnand %p3416_p1, %p3413_p0 }
   0xf   :  { %3421 = shalt.err (!%p3418_p2)
}
  0x10   :  { %s3422_s24 = scalar_lea.vmem %s46_s30, 128  ;;  %p3427_p4 = scmp.lt.s32.totalorder %s46_s30, %s46_s30 }
  0x11   :  { %p3423_p3 = scmp.ne.s32.totalorder %s46_s30, %s3422_s24  ;;  %p3428_p5 = scmp.lt.s32.totalorder %s3422_s24, %s3422_s24 }
  0x13   :  { %p3429_p6 = por %p3428_p5, %p3427_p4 }
  0x15   :  { %p3430_p7 = pnand %p3429_p6, %p3423_p3 }
  0x17   :  { %3433 = shalt.err (!%p3430_p7)
}
  0x18   :  { %48 = dma.hbm_to_vmem [thread:$0]  %s4276_s1, 128, %s46_s30, [#allocation6]  }
  0x19   :  { %s3434_s29 = scalar_lea.hbm %s4278_s3, 1024 }
  0x1a   :  { %p3435_p8 = scmp.ne.s32.totalorder %s4278_s3, %s3434_s29  ;;  %p3438_p9 = scmp.lt.u32.totalorder %s3434_s29, %s4278_s3 }
  0x1c   :  { %p3440_p10 = pnand %p3438_p9, %p3435_p8 }
  0x1e   :  { %3443 = shalt.err (!%p3440_p10)
}
  0x1f   :  { %s3444_s20 = scalar_lea.vmem %s3862_s16, 1024  ;;  %p3449_p12 = scmp.lt.s32.totalorder %s3862_s16, %s3862_s16 }
  0x20   :  { %p3445_p11 = scmp.ne.s32.totalorder %s3862_s16, %s3444_s20  ;;  %p3450_p13 = scmp.lt.s32.totalorder %s3444_s20, %s3444_s20 }
  0x22   :  { %p3451_p0 = por %p3450_p13, %p3449_p12 }
  0x24   :  { %p3452_p1 = pnand %p3451_p0, %p3445_p11 }
  0x26   :  { %3455 = shalt.err (!%p3452_p1)
}
  0x27   :  { %s3762_s1 = smov 64   ;;  %s3763_s30 = smov 4  }
  0x28   :  { %72 = dma.hbm_to_vmem [thread:$0]  %s4278_s3, 1024, %s3862_s16, [#allocation9], %s3762_s1, %s3762_s1, %s3763_s30  }
  0x29   :  { %s3764_s23 = smov [#allocation11]   ;;  %s3765_s25 = smov [#allocation14]  }
  0x2a   :  { %s90_s24 = sshll.u32 %s3764_s23, 4  ;;  %s113_s26 = sshll.u32 %s3765_s25, 4  ;;  %s91_s24 = int_to_ptr.vmem [resolvable:$true] %s90_s24  ;;  %s3896_s26 = int_to_ptr.vmem [resolvable:$true] %s113_s26 }
  0x2b   :  { %s3456_s29 = scalar_lea.hbm %s4280_s5, 3072 }
  0x2c   :  { %p3457_p2 = scmp.ne.s32.totalorder %s4280_s5, %s3456_s29  ;;  %p3460_p3 = scmp.lt.u32.totalorder %s3456_s29, %s4280_s5 }
  0x2e   :  { %p3462_p4 = pnand %p3460_p3, %p3457_p2 }
  0x30   :  { %3465 = shalt.err (!%p3462_p4)
}
  0x31   :  { %s3466_s3 = scalar_lea.vmem %s91_s24, 3072  ;;  %p3471_p6 = scmp.lt.s32.totalorder %s91_s24, %s91_s24 }
  0x32   :  { %p3467_p5 = scmp.ne.s32.totalorder %s91_s24, %s3466_s3  ;;  %p3472_p7 = scmp.lt.s32.totalorder %s3466_s3, %s3466_s3 }
  0x34   :  { %p3473_p8 = por %p3472_p7, %p3471_p6 }
  0x36   :  { %p3474_p9 = pnand %p3473_p8, %p3467_p5 }
  0x38   :  { %3477 = shalt.err (!%p3474_p9)
}
  0x39   :  { %s3766_s16 = smov 192   ;;  %s3767_s20 = smov 12  }
  0x3a   :  { %96 = dma.hbm_to_vmem [thread:$0]  %s4280_s5, 3072, %s91_s24, [#allocation12], %s3766_s16, %s3766_s16, %s3767_s20  }
  0x3b   :  { %s3478_s27 = scalar_lea.hbm %s4282_s7, 48 }
  0x3c   :  { %p3479_p10 = scmp.ne.s32.totalorder %s4282_s7, %s3478_s27  ;;  %p3482_p11 = scmp.lt.u32.totalorder %s3478_s27, %s4282_s7 }
  0x3e   :  { %p3484_p12 = pnand %p3482_p11, %p3479_p10 }
  0x40   :  { %3487 = shalt.err (!%p3484_p12)
}
  0x41   :  { %s3488_s18 = scalar_lea.vmem %s3896_s26, 48  ;;  %s3492_s5 = scalar_lea.vmem %s3896_s26, 64 }
  0x42   :  { %p3489_p13 = scmp.ne.s32.totalorder %s3896_s26, %s3488_s18  ;;  %p3493_p0 = scmp.lt.s32.totalorder %s3896_s26, %s3896_s26 }
  0x43   :  { %p3494_p1 = scmp.lt.s32.totalorder %s3492_s5, %s3488_s18 }
  0x45   :  { %p3495_p2 = por %p3494_p1, %p3493_p0 }
  0x47   :  { %p3496_p3 = pnand %p3495_p2, %p3489_p13 }
  0x49   :  { %3499 = shalt.err (!%p3496_p3)
}
  0x4a   :  { %116 = dma.hbm_to_vmem [thread:$0]  %s4282_s7, 48, %s3896_s26, [#allocation15]  }
  0x4b   :  { %s3768_s3 = smov [#allocation17]   ;;  %s3769_s22 = smov [#allocation20]  }
  0x4c   :  { %s134_s21 = sshll.u32 %s3768_s3, 4  ;;  %s156_s23 = sshll.u32 %s3769_s22, 4  ;;  %s135_s21 = int_to_ptr.vmem [resolvable:$true] %s134_s21  ;;  %s3931_s23 = int_to_ptr.vmem [resolvable:$true] %s156_s23 }
  0x4d   :  { %s3500_s28 = scalar_lea.hbm %s4284_s9, 1024 }
  0x4e   :  { %p3501_p4 = scmp.ne.s32.totalorder %s4284_s9, %s3500_s28  ;;  %p3504_p5 = scmp.lt.u32.totalorder %s3500_s28, %s4284_s9 }
  0x50   :  { %p3506_p6 = pnand %p3504_p5, %p3501_p4 }
  0x52   :  { %3509 = shalt.err (!%p3506_p6)
}
  0x53   :  { %s3510_s7 = scalar_lea.vmem %s135_s21, 1024  ;;  %p3515_p8 = scmp.lt.s32.totalorder %s135_s21, %s135_s21 }
  0x54   :  { %p3511_p7 = scmp.ne.s32.totalorder %s135_s21, %s3510_s7  ;;  %p3516_p9 = scmp.lt.s32.totalorder %s3510_s7, %s3510_s7 }
  0x56   :  { %p3517_p10 = por %p3516_p9, %p3515_p8 }
  0x58   :  { %p3518_p11 = pnand %p3517_p10, %p3511_p7 }
  0x5a   :  { %3521 = shalt.err (!%p3518_p11)
}
  0x5b   :  { %140 = dma.hbm_to_vmem [thread:$0]  %s4284_s9, 1024, %s135_s21, [#allocation18], %s3762_s1, %s3762_s1, %s3763_s30  }
  0x5c   :  { %s3522_s3 = scalar_lea.hbm %s4286_s11, 1024 }
  0x5d   :  { %p3523_p12 = scmp.ne.s32.totalorder %s4286_s11, %s3522_s3  ;;  %p3526_p13 = scmp.lt.u32.totalorder %s3522_s3, %s4286_s11 }
  0x5f   :  { %p3528_p0 = pnand %p3526_p13, %p3523_p12 }
  0x61   :  { %3531 = shalt.err (!%p3528_p0)
}
  0x62   :  { %s3532_s29 = scalar_lea.vmem %s3931_s23, 1024  ;;  %p3537_p2 = scmp.lt.s32.totalorder %s3931_s23, %s3931_s23 }
  0x63   :  { %p3533_p1 = scmp.ne.s32.totalorder %s3931_s23, %s3532_s29  ;;  %p3538_p3 = scmp.lt.s32.totalorder %s3532_s29, %s3532_s29 }
  0x65   :  { %p3539_p4 = por %p3538_p3, %p3537_p2 }
  0x67   :  { %p3540_p5 = pnand %p3539_p4, %p3533_p1 }
  0x69   :  { %3543 = shalt.err (!%p3540_p5)
}
  0x6a   :  { %162 = dma.hbm_to_vmem [thread:$0]  %s4286_s11, 1024, %s3931_s23, [#allocation21], %s3762_s1, %s3762_s1, %s3763_s30  }
  0x6b   :  { %s3770_s15 = smov [#allocation2]   ;;  %s3771_s18 = smov [#allocation7]  }
  0x6c   :  { %s35_s17 = sshll.u32 %s3770_s15, 4  ;;  %s54_s7 = sshll.u32 %s3771_s18, 4  ;;  %s36_s17 = int_to_ptr.vmem [resolvable:$true] %s35_s17  ;;  %s3968_s7 = int_to_ptr.vmem [resolvable:$true] %s54_s7 }
  0x6d   :  { %s3544_s24 = scalar_lea.hbm %s4275_s0, 128 }
  0x6e   :  { %p3545_p6 = scmp.ne.s32.totalorder %s4275_s0, %s3544_s24  ;;  %p3548_p7 = scmp.lt.u32.totalorder %s3544_s24, %s4275_s0 }
  0x70   :  { %p3550_p8 = pnand %p3548_p7, %p3545_p6 }
  0x72   :  { %3553 = shalt.err (!%p3550_p8)
}
  0x73   :  { %s3554_s11 = scalar_lea.vmem %s36_s17, 128  ;;  %p3559_p10 = scmp.lt.s32.totalorder %s36_s17, %s36_s17 }
  0x74   :  { %p3555_p9 = scmp.ne.s32.totalorder %s36_s17, %s3554_s11  ;;  %p3560_p11 = scmp.lt.s32.totalorder %s3554_s11, %s3554_s11 }
  0x76   :  { %p3561_p12 = por %p3560_p11, %p3559_p10 }
  0x78   :  { %p3562_p13 = pnand %p3561_p12, %p3555_p9 }
  0x7a   :  { %3565 = shalt.err (!%p3562_p13)
}
  0x7b   :  { %38 = dma.hbm_to_vmem [thread:$0]  %s4275_s0, 128, %s36_s17, [#allocation3]  }
  0x7c   :  { %s3566_s9 = scalar_lea.hbm %s4277_s2, 1024 }
  0x7d   :  { %p3567_p0 = scmp.ne.s32.totalorder %s4277_s2, %s3566_s9  ;;  %p3570_p1 = scmp.lt.u32.totalorder %s3566_s9, %s4277_s2 }
  0x7f   :  { %p3572_p2 = pnand %p3570_p1, %p3567_p0 }
  0x81   :  { %3575 = shalt.err (!%p3572_p2)
}
  0x82   :  { %s3576_s5 = scalar_lea.vmem %s3968_s7, 1024  ;;  %p3581_p4 = scmp.lt.s32.totalorder %s3968_s7, %s3968_s7 }
  0x83   :  { %p3577_p3 = scmp.ne.s32.totalorder %s3968_s7, %s3576_s5  ;;  %p3582_p5 = scmp.lt.s32.totalorder %s3576_s5, %s3576_s5 }
  0x85   :  { %p3583_p6 = por %p3582_p5, %p3581_p4 }
  0x87   :  { %p3584_p7 = pnand %p3583_p6, %p3577_p3 }
  0x89   :  { %3587 = shalt.err (!%p3584_p7)
}
  0x8a   :  { %s3772_s0 = smov 128   ;;  %s3773_s17 = smov 8  }
  0x8b   :  { %60 = dma.hbm_to_vmem [thread:$0]  %s4277_s2, 1024, %s3968_s7, [#allocation6], %s3772_s0, %s3772_s0, %s3773_s17  }
  0x8c   :  { %s3774_s3 = smov [#allocation10]   ;;  %s3775_s25 = smov [#allocation13]  }
  0x8d   :  { %s78_s22 = sshll.u32 %s3774_s3, 4  ;;  %s103_s11 = sshll.u32 %s3775_s25, 4  ;;  %s79_s22 = int_to_ptr.vmem [resolvable:$true] %s78_s22  ;;  %s104_s11 = int_to_ptr.vmem [resolvable:$true] %s103_s11 }
  0x8e   :  { %s3588_s28 = scalar_lea.hbm %s4279_s4, 3072 }
  0x8f   :  { %p3589_p8 = scmp.ne.s32.totalorder %s4279_s4, %s3588_s28  ;;  %p3592_p9 = scmp.lt.u32.totalorder %s3588_s28, %s4279_s4 }
  0x91   :  { %p3594_p10 = pnand %p3592_p9, %p3589_p8 }
  0x93   :  { %3597 = shalt.err (!%p3594_p10)
}
  0x94   :  { %s3598_s2 = scalar_lea.vmem %s79_s22, 3072  ;;  %p3603_p12 = scmp.lt.s32.totalorder %s79_s22, %s79_s22 }
  0x95   :  { %p3599_p11 = scmp.ne.s32.totalorder %s79_s22, %s3598_s2  ;;  %p3604_p13 = scmp.lt.s32.totalorder %s3598_s2, %s3598_s2 }
  0x97   :  { %p3605_p0 = por %p3604_p13, %p3603_p12 }
  0x99   :  { %p3606_p1 = pnand %p3605_p0, %p3599_p11 }
  0x9b   :  { %3609 = shalt.err (!%p3606_p1)
}
  0x9c   :  { %84 = dma.hbm_to_vmem [thread:$0]  %s4279_s4, 3072, %s79_s22, [#allocation9], %s3766_s16, %s3766_s16, %s3767_s20  }
  0x9d   :  { %s3610_s0 = scalar_lea.hbm %s4281_s6, 48 }
  0x9e   :  { %p3611_p2 = scmp.ne.s32.totalorder %s4281_s6, %s3610_s0  ;;  %p3614_p3 = scmp.lt.u32.totalorder %s3610_s0, %s4281_s6 }
  0xa0   :  { %p3616_p4 = pnand %p3614_p3, %p3611_p2 }
  0xa2   :  { %3619 = shalt.err (!%p3616_p4)
}
  0xa3   :  { %s3620_s25 = scalar_lea.vmem %s104_s11, 48  ;;  %s3624_s23 = scalar_lea.vmem %s104_s11, 64 }
  0xa4   :  { %p3621_p5 = scmp.ne.s32.totalorder %s104_s11, %s3620_s25  ;;  %p3625_p6 = scmp.lt.s32.totalorder %s104_s11, %s104_s11 }
  0xa5   :  { %p3626_p7 = scmp.lt.s32.totalorder %s3624_s23, %s3620_s25 }
  0xa7   :  { %p3627_p8 = por %p3626_p7, %p3625_p6 }
  0xa9   :  { %p3628_p9 = pnand %p3627_p8, %p3621_p5 }
  0xab   :  { %3631 = shalt.err (!%p3628_p9)
}
  0xac   :  { %106 = dma.hbm_to_vmem [thread:$0]  %s4281_s6, 48, %s104_s11, [#allocation12]  }
  0xad   :  { %s3776_s20 = smov [#allocation16]   ;;  %s3777_s27 = smov [#allocation19]  }
  0xae   :  { %s122_s22 = sshll.u32 %s3776_s20, 4  ;;  %s147_s28 = sshll.u32 %s3777_s27, 4  ;;  %s123_s22 = int_to_ptr.vmem [resolvable:$true] %s122_s22  ;;  %s148_s28 = int_to_ptr.vmem [resolvable:$true] %s147_s28 }
  0xaf   :  { %s3632_s21 = scalar_lea.hbm %s4283_s8, 1024 }
  0xb0   :  { %p3633_p10 = scmp.ne.s32.totalorder %s4283_s8, %s3632_s21  ;;  %p3636_p11 = scmp.lt.u32.totalorder %s3632_s21, %s4283_s8 }
  0xb2   :  { %p3638_p12 = pnand %p3636_p11, %p3633_p10 }
  0xb4   :  { %3641 = shalt.err (!%p3638_p12)
}
  0xb5   :  { %s3642_s6 = scalar_lea.vmem %s123_s22, 1024  ;;  %p3647_p0 = scmp.lt.s32.totalorder %s123_s22, %s123_s22 }
  0xb6   :  { %p3643_p13 = scmp.ne.s32.totalorder %s123_s22, %s3642_s6  ;;  %p3648_p1 = scmp.lt.s32.totalorder %s3642_s6, %s3642_s6 }
  0xb8   :  { %p3649_p2 = por %p3648_p1, %p3647_p0 }
  0xba   :  { %p3650_p3 = pnand %p3649_p2, %p3643_p13 }
  0xbc   :  { %3653 = shalt.err (!%p3650_p3)
}
  0xbd   :  { %128 = dma.hbm_to_vmem [thread:$0]  %s4283_s8, 1024, %s123_s22, [#allocation15], %s3762_s1, %s3762_s1, %s3763_s30  }
  0xbe   :  { %s3654_s17 = scalar_lea.hbm %s4285_s10, 16 }
  0xbf   :  { %p3655_p4 = scmp.ne.s32.totalorder %s4285_s10, %s3654_s17  ;;  %p3658_p5 = scmp.lt.u32.totalorder %s3654_s17, %s4285_s10 }
  0xc1   :  { %p3660_p6 = pnand %p3658_p5, %p3655_p4 }
  0xc3   :  { %3663 = shalt.err (!%p3660_p6)
}
  0xc4   :  { %s3664_s23 = scalar_lea.vmem %s148_s28, 16  ;;  %s3668_s4 = scalar_lea.vmem %s148_s28, 32 }
  0xc5   :  { %p3665_p7 = scmp.ne.s32.totalorder %s148_s28, %s3664_s23  ;;  %p3669_p8 = scmp.lt.s32.totalorder %s148_s28, %s148_s28 }
  0xc6   :  { %p3670_p9 = scmp.lt.s32.totalorder %s3668_s4, %s3664_s23 }
  0xc8   :  { %p3671_p10 = por %p3670_p9, %p3669_p8 }
  0xca   :  { %p3672_p11 = pnand %p3671_p10, %p3665_p7 }
  0xcc   :  { %3675 = shalt.err (!%p3672_p11)
}
  0xcd   :  { %150 = dma.hbm_to_vmem [thread:$0]  %s4285_s10, 16, %s148_s28, [#allocation18]  }
  0xce   :  { %s3778_s30 = smov [#allocation22]   ;;  %s3676_s27 = scalar_lea.hbm %s4287_s12, 16 }
  0xcf   :  { %s169_s16 = sshll.u32 %s3778_s30, 4  ;;  %p3677_p12 = scmp.ne.s32.totalorder %s4287_s12, %s3676_s27  ;;  %s170_s16 = int_to_ptr.vmem [resolvable:$true] %s169_s16 }
  0xd0   :  { %p3680_p13 = scmp.lt.u32.totalorder %s3676_s27, %s4287_s12 }
  0xd2   :  { %p3682_p0 = pnand %p3680_p13, %p3677_p12 }
  0xd4   :  { %3685 = shalt.err (!%p3682_p0)
}
  0xd5   :  { %s3686_s2 = scalar_lea.vmem %s170_s16, 16  ;;  %s3690_s10 = scalar_lea.vmem %s170_s16, 32 }
  0xd6   :  { %p3687_p1 = scmp.ne.s32.totalorder %s170_s16, %s3686_s2  ;;  %p3691_p2 = scmp.lt.s32.totalorder %s170_s16, %s170_s16 }
  0xd7   :  { %p3692_p3 = scmp.lt.s32.totalorder %s3690_s10, %s3686_s2 }
  0xd9   :  { %p3693_p4 = por %p3692_p3, %p3691_p2 }
  0xdb   :  { %p3694_p5 = pnand %p3693_p4, %p3687_p1 }
  0xdd   :  { %3697 = shalt.err (!%p3694_p5)
}
  0xde   :  { %172 = dma.hbm_to_vmem [thread:$0]  %s4287_s12, 16, %s170_s16, [#allocation21]  }
  0xdf   :  { %3742 = dma.done.wait [#allocation3], 128  }
  0xe0   :  { %3743 = vsyncadd [#allocation3], 4294967168 }
  0xe1   :  { %3744 = dma.done.wait [#allocation6], 1152  }
  0xe2   :  { %3745 = vsyncadd [#allocation6], 4294966144 }
  0xe3   :  { %3746 = dma.done.wait [#allocation9], 4096  }
  0xe4   :  { %3747 = vsyncadd [#allocation9], 4294963200 }
  0xe5   :  { %3748 = dma.done.wait [#allocation12], 3120  }
  0xe6   :  { %3749 = vsyncadd [#allocation12], 4294964176 }
  0xe7   :  { %3750 = dma.done.wait [#allocation15], 1072  }
  0xe8   :  { %3751 = vsyncadd [#allocation15], 4294966224 }
  0xe9   :  { %3752 = dma.done.wait [#allocation18], 1040  }
  0xea   :  { %3753 = vsyncadd [#allocation18], 4294966256 }
  0xeb   :  { %3754 = dma.done.wait [#allocation21], 1040  }
  0xec   :  { %3755 = vsyncadd [#allocation21], 4294966256  ;;  %v3779_v0 = vmov 0   ;;  %v3780_v1 = vmov 0.0   ;;  %v228_v2 = vld [vmem:[#allocation2] sm:$0xff]  ;;  %v3306_v3 = vld [vmem:[#allocation8] sm:$0xff]   ;;  %v229_v27 = vlaneseq }
  0xed   :  { %3305 = vset.pattern.permute.xlu0 %v3779_v0  ;;  %2866 = vmatprep.subr.bf16.mxu0 %v3780_v1  ;;  %vm3781_vm0 = vmmov 0   ;;  %v3307_v4 = vld [vmem:[#allocation8 + $0x8] sm:$0xff]   ;;  %v3308_v5 = vld [vmem:[#allocation8 + $0x10] sm:$0xff]   ;;  %v3309_v8 = vld [vmem:[#allocation8 + $0x18] sm:$0xff]   ;;  %v3782_v31 = vmov 1.0|1.0  }
  0xee   :  { %552 = vmatprep.mubr.bf16.mxu1 %v3779_v0  ;;  %232 = vperm.xlu0 %3305, %v228_v2   ;;  %v3314_v6 = vld [vmem:[#allocation10 + $0x4] ss:$12 sps:$4 sm:$0xff]   ;;  %v3316_v7 = vld [vmem:[#allocation10] ss:$12 sps:$4 sm:$0xff]   ;;  %v3318_v9 = vld [vmem:[#allocation10 + $0x1c] ss:$12 sps:$4 sm:$0xff]  }
  0xef   :  { %2882 = vmatprep.mubr.msk.bf16.mxu0 %vm3781_vm0, %v3780_v1  ;;  %2867 = vmatpush3.bf16.msra.mxu0 %v3306_v3  ;;  %v3320_v10 = vld [vmem:[#allocation10 + $0x18] ss:$12 sps:$4 sm:$0xff]   ;;  %v3322_v11 = vld [vmem:[#allocation10 + $0x34] ss:$12 sps:$4 sm:$0xff]   ;;  %v3324_v13 = vld [vmem:[#allocation10 + $0x30] ss:$12 sps:$4 sm:$0xff]  }
  0xf0   :  { %2868 = vmatprep.subr.bf16.mxu0 %v3780_v1  ;;  %520 = vmatprep.subr.bf16.mxu1 %v3314_v6  ;;  %v3310_v12 = vld [vmem:[#allocation8 + $0x20] sm:$0xff]   ;;  %v3326_v14 = vld [vmem:[#allocation10 + $0x4c] ss:$12 sps:$4 sm:$0xff]   ;;  %v3328_v16 = vld [vmem:[#allocation10 + $0x48] ss:$12 sps:$4 sm:$0xff]   ;;  %v230_v28 = vand.u32 127, %v229_v27 }
  0xf1   :  { %521 = vmatpush1.bf16.msra.mxu1 %v3316_v7  ;;  %v3311_v15 = vld [vmem:[#allocation8 + $0x28] sm:$0xff]   ;;  %v3330_v17 = vld [vmem:[#allocation10 + $0x64] ss:$12 sps:$4 sm:$0xff]   ;;  %v3313_v20 = vld [vmem:[#allocation8 + $0x38] sm:$0xff]   ;;  %v3783_v40 = vmov 0.0|0.0   ;;  %vm1487_vm3 = vcmask 1041409  }
  0xf2   :  { %522 = vmatprep.subr.bf16.mxu1 %v3318_v9  ;;  %v3312_v18 = vld [vmem:[#allocation8 + $0x30] sm:$0xff]   ;;  %v3332_v19 = vld [vmem:[#allocation10 + $0x60] ss:$12 sps:$4 sm:$0xff]   ;;  %v3334_v21 = vld [vmem:[#allocation10 + $0x7c] ss:$12 sps:$4 sm:$0xff]   ;;  %vm1490_vm4 = vcmask 1042434  }
  0xf3   :  { %2869 = vmatpush3.bf16.msra.mxu0 %v3307_v4  ;;  %v3336_v22 = vld [vmem:[#allocation10 + $0x78] ss:$12 sps:$4 sm:$0xff]   ;;  %v3338_v23 = vld [vmem:[#allocation10 + $0x94] ss:$12 sps:$4 sm:$0xff]   ;;  %v3340_v24 = vld [vmem:[#allocation10 + $0x90] ss:$12 sps:$4 sm:$0xff]  }
  0xf4   :  { %2870 = vmatprep.subr.bf16.mxu0 %v3780_v1  ;;  %v3342_v25 = vld [vmem:[#allocation10 + $0xac] ss:$12 sps:$4 sm:$0xff]   ;;  %v3344_v26 = vld [vmem:[#allocation10 + $0xa8] ss:$12 sps:$4 sm:$0xff]   ;;  %v3329_v34 = vld [vmem:[#allocation10 + $0x50] ss:$12 sps:$4 sm:$0xff]  }
  0xf5   :  { %523 = vmatpush1.bf16.msra.mxu1 %v3320_v10  ;;  %v3317_v30 = vld [vmem:[#allocation10 + $0x8] ss:$12 sps:$4 sm:$0xff]   ;;  %v3321_v32 = vld [vmem:[#allocation10 + $0x20] ss:$12 sps:$4 sm:$0xff]   ;;  %v3325_v33 = vld [vmem:[#allocation10 + $0x38] ss:$12 sps:$4 sm:$0xff]  }
  0xf6   :  { %524 = vmatprep.subr.bf16.mxu1 %v3322_v11  ;;  %v3333_v35 = vld [vmem:[#allocation10 + $0x68] ss:$12 sps:$4 sm:$0xff]   ;;  %v3337_v36 = vld [vmem:[#allocation10 + $0x80] ss:$12 sps:$4 sm:$0xff]   ;;  %v3341_v37 = vld [vmem:[#allocation10 + $0x98] ss:$12 sps:$4 sm:$0xff]  }
  0xf7   :  { %2871 = vmatpush3.bf16.msra.mxu0 %v3308_v5  ;;  %v3345_v38 = vld [vmem:[#allocation10 + $0xb0] ss:$12 sps:$4 sm:$0xff]   ;;  %v3348_v42 = vld [vmem:[#allocation11] ss:$12 sps:$4 sm:$0xff]   ;;  %v3370_v43 = vld [vmem:[#allocation11 + $0x8] ss:$12 sps:$4 sm:$0xff]  }
  0xf8   :  { %2872 = vmatprep.subr.bf16.mxu0 %v3780_v1  ;;  %v3346_v39 = vld [vmem:[#allocation11 + $0x4] ss:$12 sps:$4 sm:$0xff]   ;;  %v3349_v46 = vld [vmem:[#allocation11 + $0x1c] ss:$12 sps:$4 sm:$0xff]   ;;  %v3371_v50 = vld [vmem:[#allocation11 + $0x20] ss:$12 sps:$4 sm:$0xff]  }
  0xf9   :  { %525 = vmatpush1.bf16.msra.mxu1 %v3324_v13  ;;  %v3351_v49 = vld [vmem:[#allocation11 + $0x18] ss:$12 sps:$4 sm:$0xff]   ;;  %v3352_v51 = vld [vmem:[#allocation11 + $0x34] ss:$12 sps:$4 sm:$0xff]   ;;  %v3354_v52 = vld [vmem:[#allocation11 + $0x30] ss:$12 sps:$4 sm:$0xff]  }
  0xfa   :  { %526 = vmatprep.subr.bf16.mxu1 %v3326_v14  ;;  %v3372_v53 = vld [vmem:[#allocation11 + $0x38] ss:$12 sps:$4 sm:$0xff]   ;;  %v3357_v55 = vld [vmem:[#allocation11 + $0x48] ss:$12 sps:$4 sm:$0xff]   ;;  %v3373_v56 = vld [vmem:[#allocation11 + $0x50] ss:$12 sps:$4 sm:$0xff]  }
  0xfb   :  { %2873 = vmatpush3.bf16.msra.mxu0 %v3309_v8  ;;  %v3355_v54 = vld [vmem:[#allocation11 + $0x4c] ss:$12 sps:$4 sm:$0xff]   ;;  %v3358_v57 = vld [vmem:[#allocation11 + $0x64] ss:$12 sps:$4 sm:$0xff]   ;;  %v3374_v59 = vld [vmem:[#allocation11 + $0x68] ss:$12 sps:$4 sm:$0xff]  }
  0xfc   :  { %2874 = vmatprep.subr.bf16.mxu0 %v3780_v1  ;;  %v3360_v58 = vld [vmem:[#allocation11 + $0x60] ss:$12 sps:$4 sm:$0xff]   ;;  %v3361_v60 = vld [vmem:[#allocation11 + $0x7c] ss:$12 sps:$4 sm:$0xff]   ;;  %v3363_v61 = vld [vmem:[#allocation11 + $0x78] ss:$12 sps:$4 sm:$0xff]  }
  0xfd   :  { %527 = vmatpush1.bf16.msra.mxu1 %v3328_v16  ;;  %v3375_v62 = vld [vmem:[#allocation11 + $0x80] ss:$12 sps:$4 sm:$0xff]   ;;  %v3366_v0 = vld [vmem:[#allocation11 + $0x90] ss:$12 sps:$4 sm:$0xff]   ;;  %v3376_v2 = vld [vmem:[#allocation11 + $0x98] ss:$12 sps:$4 sm:$0xff]  }
  0xfe   :  { %528 = vmatprep.subr.bf16.mxu1 %v3330_v17  ;;  %v3364_v63 = vld [vmem:[#allocation11 + $0x94] ss:$12 sps:$4 sm:$0xff]   ;;  %v3367_v3 = vld [vmem:[#allocation11 + $0xac] ss:$12 sps:$4 sm:$0xff]   ;;  %v3377_v5 = vld [vmem:[#allocation11 + $0xb0] ss:$12 sps:$4 sm:$0xff]  }
  0xff   :  { %2875 = vmatpush3.bf16.msra.mxu0 %v3310_v12  ;;  %v3369_v4 = vld [vmem:[#allocation11 + $0xa8] ss:$12 sps:$4 sm:$0xff]   ;;  %v4097_v6 = vld [vmem:[#allocation5] sm:$0xff]  ;;  %v4107_v7 = vld [vmem:[#allocation7] sm:$0xff]  ;;  %v378_v8 = vshrl.u32 %v229_v27, 7  ;;  %vm1493_vm5 = vcmask 1043459  }
 0x100   :  { %2876 = vmatprep.subr.bf16.mxu0 %v3780_v1  ;;  %v375_v11 = vld [vmem:[#allocation13] sm:$0x7]  ;;  %vm1496_vm6 = vcmask 1044484   ;;  %vm1499_vm7 = vcmask 1045509   ;;  %vm1502_vm8 = vcmask 1046534   ;;  %vm1505_vm9 = vcmask 1047559  }
 0x101   :  { %529 = vmatpush1.bf16.msra.mxu1 %v3332_v19  ;;  %v379_v9 = vsub.s32 0, %v378_v8  ;;  %v387_v10 = vsub.s32 2, %v378_v8  ;;  %v383_v12 = vsub.s32 1, %v378_v8  ;;  %vm1508_vm10 = vcmask 64512   ;;  %s3785_s12 = smov [#allocation24]  }
 0x102   :  { %530 = vmatprep.subr.bf16.mxu1 %v3334_v21  ;;  %s2565_s18 = sshll.u32 %s3785_s12, 4  ;;  %s2566_s18 = int_to_ptr.vmem [resolvable:$true] %s2565_s18 }
 0x103   :  { %2877 = vmatpush3.bf16.msra.mxu0 %v3311_v15  ;;  %v380_v13 = vrot.slane %v375_v11, %v379_v9  ;;  %v388_v14 = vrot.slane %v375_v11, %v387_v10  ;;  %v384_v15 = vrot.slane %v375_v11, %v383_v12  ;;  %v4143_v11 = vld [vmem:[#allocation7 + $0x28] sm:$0xff]  ;;  %s3698_s6 = scalar_lea.vmem %s2566_s18, 128  ;;  %p3703_p7 = scmp.lt.s32.totalorder %s2566_s18, %s2566_s18 }
 0x104   :  { %2878 = vmatprep.subr.bf16.mxu0 %v3780_v1  ;;  %p3699_p6 = scmp.ne.s32.totalorder %s2566_s18, %s3698_s6  ;;  %p3704_p8 = scmp.lt.s32.totalorder %s3698_s6, %s3698_s6 }
 0x105   :  { %531 = vmatpush1.bf16.msra.mxu1 %v3336_v22 }
 0x106   :  { %532 = vmatprep.subr.bf16.mxu1 %v3338_v23  ;;  %p3705_p9 = por %p3704_p8, %p3703_p7 }
 0x107   :  { %2879 = vmatpush3.bf16.msra.mxu0 %v3312_v18 }
 0x108   :  { %2880 = vmatprep.subr.bf16.mxu0 %v3780_v1  ;;  %p3706_p10 = pnand %p3705_p9, %p3699_p6 }
 0x109   :  { %533 = vmatpush1.bf16.msra.mxu1 %v3340_v24 }
 0x10a   :  { %534 = vmatprep.subr.bf16.mxu1 %v3342_v25 }
 0x10b   :  { %2881 = vmatpush3.bf16.msra.mxu0 %v3313_v20 }
 0x10c   :  { %2886 = vmatprep.subr.bf16.mxu0 %v3780_v1 }
 0x10d   :  { %535 = vmatpush1.bf16.msra.mxu1 %v3344_v26 }
 0x10e   :  { %3127 = vmatprep.subr.bf16.mxu1 %v3346_v39 }
 0x16d   :  { %v233_v29 = vpop.permute.xlu0 %232 }
 0x16e   :  { %vm234_vm1 = vcmp.eq.s32.totalorder %v233_v29, %v230_v28  ;;  %v681_v28 = vld [vmem:[#allocation14] sm:$0x7] }
 0x16f   :  { %vm2593_vm2 = vmpackc.low %vm234_vm1, %vm234_vm1  ;;  %v686_v27 = vrot.slane %v681_v28, %v379_v9  ;;  %v694_v29 = vrot.slane %v681_v28, %v387_v10 }
 0x170   :  { %2883 = vmatmul.mubr.msk.bf16.vlgmr.msra.gmra.mrb[0].mxu0 %vm2593_vm2, %v3782_v31 }
 0x171   :  { %2887 = vmatpush3.bf16.msra.mxu0 %v3317_v30  ;;  %2902 = vmatprep.mubr.msk.bf16.mxu0 %vm3781_vm0, %v3780_v1  ;;  %v690_v30 = vrot.slane %v681_v28, %v383_v12 }
 0x172   :  { %2888 = vmatprep.subr.bf16.mxu0 %v3780_v1 }
 0x175   :  { %2889 = vmatpush3.bf16.msra.mxu0 %v3321_v32 }
 0x176   :  { %2890 = vmatprep.subr.bf16.mxu0 %v3780_v1 }
 0x179   :  { %2891 = vmatpush3.bf16.msra.mxu0 %v3325_v33 }
 0x17a   :  { %2892 = vmatprep.subr.bf16.mxu0 %v3780_v1 }
 0x17d   :  { %2893 = vmatpush3.bf16.msra.mxu0 %v3329_v34 }
 0x17e   :  { %2894 = vmatprep.subr.bf16.mxu0 %v3780_v1 }
 0x181   :  { %2895 = vmatpush3.bf16.msra.mxu0 %v3333_v35 }
 0x182   :  { %2896 = vmatprep.subr.bf16.mxu0 %v3780_v1 }
 0x185   :  { %2897 = vmatpush3.bf16.msra.mxu0 %v3337_v36 }
 0x186   :  { %2898 = vmatprep.subr.bf16.mxu0 %v3780_v1 }
 0x189   :  { %2899 = vmatpush3.bf16.msra.mxu0 %v3341_v37 }
 0x18a   :  { %2900 = vmatprep.subr.bf16.mxu0 %v3780_v1 }
 0x18d   :  { %2901 = vmatpush3.bf16.msra.mxu0 %v3345_v38 }
 0x18e   :  { %3158 = vmatprep.subr.bf16.mxu0 %v3783_v40 }
 0x243   :  { %v336_v41 = vpop.f32.mrb[0].mxu0 }
 0x244   :  { %v342_v44 = vpack.c.bf16 %v336_v41, %v336_v41  ;;  %v2884_v45 = vpop.f32.mrb[1].mxu0 }
 0x245   :  { %v339_v47 = vpop.f32.mrb[2].mxu0 }
 0x246   :  { %v2885_v48 = vpop.f32.mrb[3].mxu0  ;;  %553 = vmatmul.mubr.bf16.vlgmr.msra.gmra.mrb[0].mxu1 %v342_v44  ;;  %2903 = vmatmul.mubr.bf16.vlgmr.msra.gmra.mrb[4].mxu0 %v342_v44 }
 0x247   :  { %3129 = vmatpush1.bf16.msra.mxu1 %v3348_v42  ;;  %3160 = vmatpush3.bf16.msra.mxu0 %v3370_v43 }
 0x248   :  { %3131 = vmatprep.subr.bf16.mxu1 %v3349_v46  ;;  %762 = vmatprep.mubr.f32.mxu1 %v3780_v1 }
 0x249   :  { %3161 = vmatprep.subr.bf16.mxu0 %v3783_v40  ;;  %2938 = vmatprep.mubr.msk.f32.mxu0 %vm3781_vm0, %v3780_v1 }
 0x24b   :  { %3133 = vmatpush1.bf16.msra.mxu1 %v3351_v49  ;;  %3163 = vmatpush3.bf16.msra.mxu0 %v3371_v50  ;;  %v3784_v50 = vmov 1966171168  }
 0x24c   :  { %3135 = vmatprep.subr.bf16.mxu1 %v3352_v51  ;;  %3164 = vmatprep.subr.bf16.mxu0 %v3783_v40  ;;  %v863_v51 = vunpack.c.l.s4 %v3784_v50 }
 0x24f   :  { %3137 = vmatpush1.bf16.msra.mxu1 %v3354_v52  ;;  %3166 = vmatpush3.bf16.msra.mxu0 %v3372_v53  ;;  %v864_v53 = vunpack.c.0.s8 %v863_v51 }
 0x250   :  { %3139 = vmatprep.subr.bf16.mxu1 %v3355_v54  ;;  %3167 = vmatprep.subr.bf16.mxu0 %v3783_v40 }
 0x253   :  { %3141 = vmatpush1.bf16.msra.mxu1 %v3357_v55  ;;  %3169 = vmatpush3.bf16.msra.mxu0 %v3373_v56  ;;  %v867_v56 = vsub.s32 %v864_v53, %v378_v8  ;;  %v4137_v8 = vld [vmem:[#allocation7 + $0x20] sm:$0xff] }
 0x254   :  { %3143 = vmatprep.subr.bf16.mxu1 %v3358_v57  ;;  %3170 = vmatprep.subr.bf16.mxu0 %v3783_v40 }
 0x257   :  { %3145 = vmatpush1.bf16.msra.mxu1 %v3360_v58  ;;  %3172 = vmatpush3.bf16.msra.mxu0 %v3374_v59 }
 0x258   :  { %3147 = vmatprep.subr.bf16.mxu1 %v3361_v60  ;;  %3173 = vmatprep.subr.bf16.mxu0 %v3783_v40 }
 0x25b   :  { %3149 = vmatpush1.bf16.msra.mxu1 %v3363_v61  ;;  %3175 = vmatpush3.bf16.msra.mxu0 %v3375_v62  ;;  %v4117_v62 = vld [vmem:[#allocation7 + $0x8] sm:$0xff] }
 0x25c   :  { %3151 = vmatprep.subr.bf16.mxu1 %v3364_v63  ;;  %3176 = vmatprep.subr.bf16.mxu0 %v3783_v40 }
 0x25f   :  { %3153 = vmatpush1.bf16.msra.mxu1 %v3366_v0  ;;  %3178 = vmatpush3.bf16.msra.mxu0 %v3376_v2  ;;  %v4123_v2 = vld [vmem:[#allocation7 + $0x10] sm:$0xff] }
 0x260   :  { %3155 = vmatprep.subr.bf16.mxu1 %v3367_v3  ;;  %3179 = vmatprep.subr.bf16.mxu0 %v3783_v40 }
 0x263   :  { %3157 = vmatpush1.bf16.msra.mxu1 %v3369_v4  ;;  %3181 = vmatpush3.bf16.msra.mxu0 %v3377_v5  ;;  %v4129_v4 = vld [vmem:[#allocation7 + $0x18] sm:$0xff] }
 0x264   :  { %2941 = vmatprep.subr.mxu1 %v3780_v1  ;;  %3182 = vmatprep.subr.bf16.mxu0 %v3783_v40 }
 0x266   :  { %763 = vmatmul.mubr.f32.vlgmr.msra.gmra.mrb[4].mxu1 %v4097_v6  ;;  %2939 = vmatmul.mubr.f32.vlgmr.msra.gmra.mrb[8].mxu0 %v4097_v6 }
 0x267   :  { %2943 = vmatprep.mubr.msk.f32.mxu1 %vm3781_vm0, %v3780_v1  ;;  %3053 = vmatprep.mubr.msk.f32.mxu0 %vm3781_vm0, %v3780_v1 }
 0x26c   :  { %2942 = vmatpush3.xpose.msra.mxu1 %v4107_v7 }
 0x26d   :  { %2946 = vmatprep.subr.mxu1 %v3780_v1 }
 0x319   :  { %v554_v16 = vpop.f32.mrb[0].mxu1  ;;  %v595_v17 = vpop.f32.mrb[4].mxu0 }
 0x31a   :  { %v555_v18 = vadd.f32 %v554_v16, %v380_v13  ;;  %v596_v19 = vadd.f32 %v595_v17, %v388_v14  ;;  %v556_v20 = vpop.f32.mrb[1].mxu1  ;;  %v2904_v21 = vpop.f32.mrb[5].mxu0  ;;  %v4149_v14 = vld [vmem:[#allocation7 + $0x30] sm:$0xff]  ;;  %v4155_v16 = vld [vmem:[#allocation7 + $0x38] sm:$0xff] }
 0x31b   :  { %v557_v22 = vadd.f32 %v556_v20, %v384_v15  ;;  %v558_v23 = vpop.f32.mrb[2].mxu1  ;;  %v598_v24 = vpop.f32.mrb[6].mxu0 }
 0x31c   :  { %v559_v25 = vpop.f32.mrb[3].mxu1  ;;  %v2905_v26 = vpop.f32.mrb[7].mxu0 }
 0x339   :  { %v764_v31 = vpop.f32.mrb[4].mxu1  ;;  %v835_v32 = vpop.f32.mrb[8].mxu0 }
 0x33a   :  { %v765_v33 = vadd.f32 %v764_v31, %v686_v27  ;;  %v766_v34 = vpop.f32.mrb[5].mxu1  ;;  %v836_v35 = vadd.f32 %v835_v32, %v694_v29  ;;  %v2940_v36 = vpop.f32.mrb[9].mxu0 }
 0x33b   :  { %v767_v37 = vadd.f32 %v766_v34, %v690_v30 }
 0x33c   :  { %v839_v38 = vadd.f32 %v765_v33, %v555_v18 }
 0x33d   :  { %v846_v39 = vadd.f32 %v767_v37, %v557_v22 }
 0x33e   :  { %v2619_v41 = vmul.f32 -1.442695, %v839_v38 }
 0x33f   :  { %v2620_v42 = vmul.f32 -1.442695, %v846_v39 }
 0x340   :  { %3378 = vpow2.f32 %v2619_v41 }
 0x341   :  { %3380 = vpow2.f32 %v2620_v42 }
 0x34a   :  { %v3379_v43 = vpop.eup %3378 }
 0x34b   :  { %v843_v44 = vadd.f32 1.0, %v3379_v43  ;;  %v3381_v45 = vpop.eup %3380 }
 0x34c   :  { %v850_v46 = vadd.f32 1.0, %v3381_v45 }
 0x34d   :  { %3382 = vrcp.f32 %v843_v44 }
 0x34e   :  { %3384 = vrcp.f32 %v850_v46 }
 0x357   :  { %v3383_v47 = vpop.eup %3382 }
 0x358   :  { %v853_v48 = vmul.f32 %v3383_v47, %v836_v35  ;;  %v3385_v52 = vpop.eup %3384 }
 0x359   :  { %v856_v54 = vsub.f32 1.0, %v3385_v52  ;;  %v858_v57 = vmul.f32 %v3385_v52, %v4097_v6 }
 0x35a   :  { %v854_v49 = vadd.f32 %v853_v48, %v596_v19 }
 0x35c   :  { %3386 = vtanh.f32 %v854_v49 }
 0x366   :  { %v3387_v55 = vpop.eup %3386 }
 0x367   :  { %v857_v58 = vmul.f32 %v3387_v55, %v856_v54 }
 0x369   :  { %v4113_v59 = vadd.f32 %v858_v57, %v857_v58 }
 0x36b   :  { %v868_v60 = vrot.slane %v4113_v59, %v867_v56  ;;  %2548 = vst [vmem:[#allocation24] sm:$0xff] %v4113_v59  ;;  %v861_v5 = vcombine.high %v4113_v59, %v4113_v59 }
 0x36d   :  { %v884_v61 = vrot.slane %v868_v60, %v867_v56  ;;  %v876_v63 = vcombine.high %v868_v60, %v868_v60  ;;  %v875_v9 = vrot.slane %v861_v5, %v867_v56 }
 0x36f   :  { %2944 = vmatmul.mubr.f32.vlgmr.msra.gmra.mrb[6].mxu1 %v884_v61  ;;  %v898_v0 = vrot.slane %v876_v63, %v867_v56  ;;  %v906_v3 = vcombine.high %v884_v61, %v884_v61  ;;  %v891_v10 = vrot.slane %v875_v9, %v867_v56  ;;  %v877_v12 = vcombine.high %v875_v9, %v875_v9 }
 0x370   :  { %2947 = vmatpush3.xpose.msra.mxu1 %v4117_v62  ;;  %2948 = vmatprep.mubr.msk.f32.mxu1 %vm3781_vm0, %v3780_v1 }
 0x371   :  { %2951 = vmatprep.subr.mxu1 %v3780_v1  ;;  %v908_v6 = vcombine.high %v898_v0, %v898_v0  ;;  %v905_v13 = vrot.slane %v877_v12, %v867_v56  ;;  %v907_v15 = vcombine.high %v891_v10, %v891_v10 }
 0x373   :  { %2949 = vmatmul.mubr.f32.vlgmr.msra.gmra.mrb[8].mxu1 %v898_v0  ;;  %v909_v17 = vcombine.high %v905_v13, %v905_v13 }
 0x374   :  { %2952 = vmatpush3.xpose.msra.mxu1 %v4123_v2  ;;  %2953 = vmatprep.mubr.msk.f32.mxu1 %vm3781_vm0, %v3780_v1 }
 0x375   :  { %2956 = vmatprep.subr.mxu1 %v3780_v1 }
 0x377   :  { %2954 = vmatmul.mubr.f32.vlgmr.msra.gmra.mrb[10].mxu1 %v906_v3 }
 0x378   :  { %2957 = vmatpush3.xpose.msra.mxu1 %v4129_v4  ;;  %2958 = vmatprep.mubr.msk.f32.mxu1 %vm3781_vm0, %v3780_v1 }
 0x379   :  { %2961 = vmatprep.subr.mxu1 %v3780_v1 }
 0x37b   :  { %2959 = vmatmul.mubr.f32.vlgmr.msra.gmra.mrb[12].mxu1 %v908_v6 }
 0x37c   :  { %2962 = vmatpush3.xpose.msra.mxu1 %v4137_v8  ;;  %2963 = vmatprep.mubr.msk.f32.mxu1 %vm3781_vm0, %v3780_v1 }
 0x37d   :  { %2966 = vmatprep.subr.mxu1 %v3780_v1 }
 0x37f   :  { %2964 = vmatmul.mubr.f32.vlgmr.msra.gmra.mrb[14].mxu1 %v891_v10 }
 0x380   :  { %2967 = vmatpush3.xpose.msra.mxu1 %v4143_v11  ;;  %2968 = vmatprep.mubr.msk.f32.mxu1 %vm3781_vm0, %v3780_v1 }
 0x381   :  { %2971 = vmatprep.subr.mxu1 %v3780_v1 }
 0x383   :  { %2969 = vmatmul.mubr.f32.vlgmr.msra.gmra.mrb[16].mxu1 %v905_v13 }
 0x384   :  { %2972 = vmatpush3.xpose.msra.mxu1 %v4149_v14  ;;  %2973 = vmatprep.mubr.msk.f32.mxu1 %vm3781_vm0, %v3780_v1 }
 0x385   :  { %2976 = vmatprep.subr.mxu1 %v3780_v1 }
 0x387   :  { %2974 = vmatmul.mubr.f32.vlgmr.msra.gmra.mrb[18].mxu1 %v907_v15 }
 0x388   :  { %2977 = vmatpush3.xpose.msra.mxu1 %v4155_v16  ;;  %2978 = vmatprep.mubr.msk.f32.mxu1 %vm3781_vm0, %v3780_v1 }
 0x389   :  { %2981 = vmatprep.subr.mxu1 %v3780_v1 }
 0x38b   :  { %2979 = vmatmul.mubr.f32.vlgmr.msra.gmra.mrb[20].mxu1 %v909_v17 }
 0x38c   :  { %2982 = vmatpush3.msra.mxu1 %v4107_v7  ;;  %2983 = vmatprep.mubr.msk.f32.mxu1 %vm3781_vm0, %v3780_v1 }
 0x38d   :  { %2986 = vmatprep.subr.mxu1 %v3780_v1 }
 0x442   :  { %v984_v18 = vpop.f32.mrb[6].mxu1 }
 0x443   :  { %v2945_v19 = vpop.f32.mrb[7].mxu1 }
 0x446   :  { %v1054_v20 = vpop.f32.mrb[8].mxu1 }
 0x447   :  { %v1486_v21 = vrot.slane %v1054_v20, 7  ;;  %v2950_v22 = vpop.f32.mrb[9].mxu1 }
 0x449   :  { %v1488_v23 = vsel %vm1487_vm3, %v1486_v21, %v984_v18 }
 0x44a   :  { %v1124_v24 = vpop.f32.mrb[10].mxu1 }
 0x44b   :  { %v1489_v25 = vrot.slane %v1124_v24, 6  ;;  %v2955_v26 = vpop.f32.mrb[11].mxu1 }
 0x44d   :  { %v1491_v28 = vsel %vm1490_vm4, %v1489_v25, %v1488_v23 }
 0x44e   :  { %v1194_v7 = vpop.f32.mrb[12].mxu1 }
 0x44f   :  { %v1492_v27 = vrot.slane %v1194_v7, 5  ;;  %v2960_v29 = vpop.f32.mrb[13].mxu1 }
 0x451   :  { %v1494_v30 = vsel %vm1493_vm5, %v1492_v27, %v1491_v28 }
 0x452   :  { %v1264_v31 = vpop.f32.mrb[14].mxu1 }
 0x453   :  { %v1495_v32 = vrot.slane %v1264_v31, 4  ;;  %v2965_v33 = vpop.f32.mrb[15].mxu1 }
 0x455   :  { %v1497_v34 = vsel %vm1496_vm6, %v1495_v32, %v1494_v30 }
 0x456   :  { %v1334_v35 = vpop.f32.mrb[16].mxu1 }
 0x457   :  { %v1498_v36 = vrot.slane %v1334_v35, 3  ;;  %v2970_v37 = vpop.f32.mrb[17].mxu1 }
 0x459   :  { %v1500_v38 = vsel %vm1499_vm7, %v1498_v36, %v1497_v34 }
 0x45a   :  { %v1404_v39 = vpop.f32.mrb[18].mxu1 }
 0x45b   :  { %v1501_v41 = vrot.slane %v1404_v39, 2  ;;  %v2975_v42 = vpop.f32.mrb[19].mxu1 }
 0x45d   :  { %v1503_v43 = vsel %vm1502_vm8, %v1501_v41, %v1500_v38 }
 0x45e   :  { %v1474_v44 = vpop.f32.mrb[20].mxu1 }
 0x45f   :  { %v1504_v45 = vrot.slane %v1474_v44, 1  ;;  %v2980_v46 = vpop.f32.mrb[21].mxu1 }
 0x461   :  { %v1506_v47 = vsel %vm1505_vm9, %v1504_v45, %v1503_v43 }
 0x462   :  { %v1509_v48 = vsel %vm1508_vm10, %v1506_v47, -inf }
 0x463   :  { %1510 = vmax.xlane.f32.xlu0 %v1509_v48 }
 0x4f0   :  { %v1511_v49 = vpop.xlane.xlu0 %1510 }
 0x4f1   :  { %v1513_v50 = vrot.slane %v1511_v49, 1  ;;  %v1514_v51 = vrot.slane %v1511_v49, 2  ;;  %v1515_v52 = vrot.slane %v1511_v49, 3  ;;  %v1516_v53 = vrot.slane %v1511_v49, 4 }
 0x4f2   :  { %v1517_v54 = vrot.slane %v1511_v49, 5  ;;  %v1518_v55 = vrot.slane %v1511_v49, 6  ;;  %v1519_v56 = vrot.slane %v1511_v49, 7  ;;  %v1528_v57 = vsub.f32 %v984_v18, %v1511_v49 }
 0x4f3   :  { %v1529_v58 = vsub.f32 %v1054_v20, %v1513_v50  ;;  %v1530_v60 = vsub.f32 %v1124_v24, %v1514_v51  ;;  %v1531_v61 = vsub.f32 %v1194_v7, %v1515_v52  ;;  %v1532_v63 = vsub.f32 %v1264_v31, %v1516_v53 }
 0x4f4   :  { %v1533_v0 = vsub.f32 %v1334_v35, %v1517_v54  ;;  %v1534_v3 = vsub.f32 %v1404_v39, %v1518_v55  ;;  %v1536_v5 = vmul.f32 1.442695, %v1528_v57  ;;  %v1535_v12 = vsub.f32 %v1474_v44, %v1519_v56  ;;  %v2632_v57 = vld [vmem:[#allocation16] sm:$0xff]  }
 0x4f5   :  { %v1538_v6 = vmul.f32 1.442695, %v1529_v58  ;;  %v1540_v9 = vmul.f32 1.442695, %v1530_v60  ;;  %v1542_v10 = vmul.f32 1.442695, %v1531_v61 }
 0x4f6   :  { %3388 = vpow2.f32 %v1536_v5  ;;  %v1544_v13 = vmul.f32 1.442695, %v1532_v63  ;;  %v1546_v15 = vmul.f32 1.442695, %v1533_v0  ;;  %v1548_v17 = vmul.f32 1.442695, %v1534_v3 }
 0x4f7   :  { %3390 = vpow2.f32 %v1538_v6  ;;  %v1550_v19 = vmul.f32 1.442695, %v1535_v12  ;;  %v2729_v58 = vld [vmem:[#allocation16 + $0x18] sm:$0xff]   ;;  %v2730_v60 = vld [vmem:[#allocation16 + $0x20] sm:$0xff]   ;;  %v2731_v61 = vld [vmem:[#allocation16 + $0x28] sm:$0xff]  }
 0x4f8   :  { %3392 = vpow2.f32 %v1540_v9  ;;  %v2732_v63 = vld [vmem:[#allocation16 + $0x30] sm:$0xff]   ;;  %v2733_v0 = vld [vmem:[#allocation16 + $0x38] sm:$0xff]   ;;  %v2664_v3 = vld [vmem:[#allocation17] sm:$0xff]  }
 0x4f9   :  { %3394 = vpow2.f32 %v1542_v10  ;;  %3184 = vmatpush3.bf16.msra.mxu0 %v2664_v3  ;;  %v2734_v5 = vld [vmem:[#allocation17 + $0x8] sm:$0xff]   ;;  %v2735_v6 = vld [vmem:[#allocation17 + $0x10] sm:$0xff]   ;;  %v2736_v9 = vld [vmem:[#allocation17 + $0x18] sm:$0xff]  }
 0x4fa   :  { %3396 = vpow2.f32 %v1544_v13  ;;  %3185 = vmatprep.subr.bf16.mxu0 %v3783_v40  ;;  %v2737_v10 = vld [vmem:[#allocation17 + $0x20] sm:$0xff]   ;;  %v2739_v12 = vld [vmem:[#allocation17 + $0x30] sm:$0xff]   ;;  %v2740_v13 = vld [vmem:[#allocation17 + $0x38] sm:$0xff]  }
 0x4fb   :  { %3398 = vpow2.f32 %v1546_v15 }
 0x4fc   :  { %3400 = vpow2.f32 %v1548_v17 }
 0x4fd   :  { %3402 = vpow2.f32 %v1550_v19  ;;  %3187 = vmatpush3.bf16.msra.mxu0 %v2734_v5 }
 0x4fe   :  { %3188 = vmatprep.subr.bf16.mxu0 %v3783_v40 }
 0x500   :  { %v3389_v18 = vpop.eup %3388 }
 0x501   :  { %v3391_v20 = vpop.eup %3390  ;;  %3190 = vmatpush3.bf16.msra.mxu0 %v2735_v6 }
 0x502   :  { %v3393_v21 = vpop.eup %3392  ;;  %v1560_v22 = vrot.slane %v3391_v20, 7  ;;  %3191 = vmatprep.subr.bf16.mxu0 %v3783_v40 }
 0x503   :  { %v3395_v23 = vpop.eup %3394  ;;  %v1562_v24 = vrot.slane %v3393_v21, 6 }
 0x504   :  { %v3397_v25 = vpop.eup %3396  ;;  %v1561_v26 = vsel %vm1487_vm3, %v1560_v22, %v3389_v18  ;;  %v1564_v28 = vrot.slane %v3395_v23, 5 }
 0x505   :  { %v3399_v7 = vpop.eup %3398  ;;  %v1563_v27 = vsel %vm1490_vm4, %v1562_v24, %v1561_v26  ;;  %v1566_v29 = vrot.slane %v3397_v25, 4  ;;  %3193 = vmatpush3.bf16.msra.mxu0 %v2736_v9 }
 0x506   :  { %v3401_v30 = vpop.eup %3400  ;;  %v1565_v31 = vsel %vm1493_vm5, %v1564_v28, %v1563_v27  ;;  %v1568_v32 = vrot.slane %v3399_v7, 3  ;;  %3194 = vmatprep.subr.bf16.mxu0 %v3783_v40 }
 0x507   :  { %v3403_v33 = vpop.eup %3402  ;;  %v1567_v34 = vsel %vm1496_vm6, %v1566_v29, %v1565_v31  ;;  %v1570_v35 = vrot.slane %v3401_v30, 2 }
 0x508   :  { %v1569_v36 = vsel %vm1499_vm7, %v1568_v32, %v1567_v34  ;;  %v1572_v37 = vrot.slane %v3403_v33, 1 }
 0x509   :  { %v1571_v38 = vsel %vm1502_vm8, %v1570_v35, %v1569_v36  ;;  %3196 = vmatpush3.bf16.msra.mxu0 %v2737_v10 }
 0x50a   :  { %v1573_v39 = vsel %vm1505_vm9, %v1572_v37, %v1571_v38  ;;  %3197 = vmatprep.subr.bf16.mxu0 %v3783_v40 }
 0x50b   :  { %v1575_v41 = vsel %vm1508_vm10, %v1573_v39, 0.0 }
 0x50c   :  { %1576 = vadd.xlane.f32.xlu1 %v1575_v41 }
 0x599   :  { %v1577_v42 = vpop.xlane.xlu1 %1576 }
 0x59a   :  { %3404 = vrcp.f32 %v1577_v42 }
 0x5a4   :  { %v3405_v43 = vpop.eup %3404 }
 0x5a5   :  { %v1579_v44 = vmul.f32 %v3405_v43, %v1577_v42 }
 0x5a7   :  { %v1580_v45 = vsub.f32 2.0, %v1579_v44 }
 0x5a9   :  { %v1581_v46 = vmul.f32 %v3405_v43, %v1580_v45  ;;  %v2696_v45 = vld [vmem:[#allocation20] sm:$0xff]  }
 0x5ab   :  { %v1598_v47 = vmul.f32 %v3389_v18, %v1581_v46  ;;  %v1583_v48 = vrot.slane %v1581_v46, 1  ;;  %v1584_v50 = vrot.slane %v1581_v46, 2  ;;  %v1585_v52 = vrot.slane %v1581_v46, 3 }
 0x5ac   :  { %v1586_v53 = vrot.slane %v1581_v46, 4  ;;  %v1587_v54 = vrot.slane %v1581_v46, 5  ;;  %v1588_v55 = vrot.slane %v1581_v46, 6  ;;  %v1589_v56 = vrot.slane %v1581_v46, 7 }
 0x5ad   :  { %2984 = vmatmul.mubr.msk.f32.vlgmr.msra.gmra.mrb[22].mxu1 %vm1508_vm10, %v1598_v47  ;;  %v1599_v49 = vmul.f32 %v3391_v20, %v1583_v48  ;;  %v1600_v51 = vmul.f32 %v3393_v21, %v1584_v50  ;;  %v2741_v47 = vld [vmem:[#allocation20 + $0x8] sm:$0xff]   ;;  %v2742_v48 = vld [vmem:[#allocation20 + $0x10] sm:$0xff]  }
 0x5ae   :  { %2987 = vmatpush3.msra.mxu1 %v4117_v62  ;;  %2988 = vmatprep.mubr.msk.f32.mxu1 %vm3781_vm0, %v3780_v1  ;;  %v1601_v62 = vmul.f32 %v3395_v23, %v1585_v52  ;;  %v2744_v52 = vld [vmem:[#allocation20 + $0x20] sm:$0xff]  }
 0x5af   :  { %2991 = vmatprep.subr.mxu1 %v3780_v1 }
 0x5b1   :  { %2989 = vmatmul.mubr.msk.f32.vlgmr.msra.gmra.mrb[24].mxu1 %vm1508_vm10, %v1599_v49  ;;  %v2743_v49 = vld [vmem:[#allocation20 + $0x18] sm:$0xff]  }
 0x5b2   :  { %2992 = vmatpush3.msra.mxu1 %v4123_v2  ;;  %2993 = vmatprep.mubr.msk.f32.mxu1 %vm3781_vm0, %v3780_v1  ;;  %v1602_v2 = vmul.f32 %v3397_v25, %v1586_v53  ;;  %v2747_v53 = vld [vmem:[#allocation20 + $0x38] sm:$0xff]  }
 0x5b3   :  { %2996 = vmatprep.subr.mxu1 %v3780_v1 }
 0x5b5   :  { %2994 = vmatmul.mubr.msk.f32.vlgmr.msra.gmra.mrb[26].mxu1 %vm1508_vm10, %v1600_v51 }
 0x5b6   :  { %2997 = vmatpush3.msra.mxu1 %v4129_v4  ;;  %2998 = vmatprep.mubr.msk.f32.mxu1 %vm3781_vm0, %v3780_v1  ;;  %v1603_v4 = vmul.f32 %v3399_v7, %v1587_v54  ;;  %v2629_v54 = vld [vmem:[#allocation19] ss:$0 sm:$0xff] }
 0x5b7   :  { %3001 = vmatprep.subr.mxu1 %v3780_v1 }
 0x5b9   :  { %2999 = vmatmul.mubr.msk.f32.vlgmr.msra.gmra.mrb[28].mxu1 %vm1508_vm10, %v1601_v62  ;;  %v2746_v62 = vld [vmem:[#allocation20 + $0x30] sm:$0xff]  }
 0x5ba   :  { %3002 = vmatpush3.msra.mxu1 %v4137_v8  ;;  %3003 = vmatprep.mubr.msk.f32.mxu1 %vm3781_vm0, %v3780_v1  ;;  %v1604_v8 = vmul.f32 %v3401_v30, %v1588_v55 }
 0x5bb   :  { %3006 = vmatprep.subr.mxu1 %v3780_v1 }
 0x5bd   :  { %3004 = vmatmul.mubr.msk.f32.vlgmr.msra.gmra.mrb[30].mxu1 %vm1508_vm10, %v1602_v2 }
 0x5be   :  { %3007 = vmatpush3.msra.mxu1 %v4143_v11  ;;  %3008 = vmatprep.mubr.msk.f32.mxu1 %vm3781_vm0, %v3780_v1  ;;  %v1605_v11 = vmul.f32 %v3403_v33, %v1589_v56 }
 0x5bf   :  { %3011 = vmatprep.subr.mxu1 %v3780_v1 }
 0x5c1   :  { %3009 = vmatmul.mubr.msk.f32.vlgmr.msra.gmra.mrb[32].mxu1 %vm1508_vm10, %v1603_v4 }
 0x5c2   :  { %3012 = vmatpush3.msra.mxu1 %v4149_v14  ;;  %3013 = vmatprep.mubr.msk.f32.mxu1 %vm3781_vm0, %v3780_v1  ;;  %v2727_v14 = vld [vmem:[#allocation16 + $0x8] sm:$0xff]  }
 0x5c3   :  { %3016 = vmatprep.subr.mxu1 %v3780_v1 }
 0x5c5   :  { %3014 = vmatmul.mubr.msk.f32.vlgmr.msra.gmra.mrb[34].mxu1 %vm1508_vm10, %v1604_v8 }
 0x5c6   :  { %3017 = vmatpush3.msra.mxu1 %v4155_v16  ;;  %3018 = vmatprep.mubr.msk.f32.mxu1 %vm3781_vm0, %v3780_v1  ;;  %v2728_v16 = vld [vmem:[#allocation16 + $0x10] sm:$0xff]  }
 0x5c7   :  { %3206 = vmatprep.subr.bf16.mxu1 %v3783_v40 }
 0x5c9   :  { %3019 = vmatmul.mubr.msk.f32.vlgmr.msra.gmra.mrb[36].mxu1 %vm1508_vm10, %v1605_v11  ;;  %v2630_v11 = vld [vmem:[#allocation22] ss:$0 sm:$0xff] }
 0x5ca   :  { %3208 = vmatpush3.bf16.msra.mxu1 %v2632_v57  ;;  %3088 = vmatprep.mubr.msk.f32.mxu1 %vm3781_vm0, %v3780_v1 }
 0x5cb   :  { %3209 = vmatprep.subr.bf16.mxu1 %v3783_v40 }
 0x5ce   :  { %3211 = vmatpush3.bf16.msra.mxu1 %v2727_v14 }
 0x5cf   :  { %3212 = vmatprep.subr.bf16.mxu1 %v3783_v40 }
 0x5d2   :  { %3214 = vmatpush3.bf16.msra.mxu1 %v2728_v16 }
 0x5d3   :  { %3215 = vmatprep.subr.bf16.mxu1 %v3783_v40 }
 0x5d6   :  { %3217 = vmatpush3.bf16.msra.mxu1 %v2729_v58 }
 0x5d7   :  { %3218 = vmatprep.subr.bf16.mxu1 %v3783_v40 }
 0x5da   :  { %3220 = vmatpush3.bf16.msra.mxu1 %v2730_v60 }
 0x5db   :  { %3221 = vmatprep.subr.bf16.mxu1 %v3783_v40 }
 0x5de   :  { %3223 = vmatpush3.bf16.msra.mxu1 %v2731_v61 }
 0x5df   :  { %3224 = vmatprep.subr.bf16.mxu1 %v3783_v40 }
 0x5e2   :  { %3226 = vmatpush3.bf16.msra.mxu1 %v2732_v63 }
 0x5e3   :  { %3227 = vmatprep.subr.bf16.mxu1 %v3783_v40 }
 0x5e6   :  { %3229 = vmatpush3.bf16.msra.mxu1 %v2733_v0 }
 0x5e9   :  { %3089 = vmatmul.mubr.f32.vlgmr.msra.gmra.mrb[38].mxu1 %v4113_v59  ;;  %v2738_v59 = vld [vmem:[#allocation17 + $0x28] sm:$0xff]  }
 0x5ea   :  { %3199 = vmatpush3.bf16.msra.mxu0 %v2738_v59 }
 0x5eb   :  { %3200 = vmatprep.subr.bf16.mxu0 %v3783_v40 }
 0x5ee   :  { %3202 = vmatpush3.bf16.msra.mxu0 %v2739_v12 }
 0x5ef   :  { %3203 = vmatprep.subr.bf16.mxu0 %v3783_v40 }
 0x5f2   :  { %3205 = vmatpush3.bf16.msra.mxu0 %v2740_v13 }
 0x5f3   :  { %3230 = vmatprep.subr.bf16.mxu0 %v3783_v40 }
 0x680   :  { %v1675_v15 = vpop.f32.mrb[22].mxu1 }
 0x681   :  { %v2985_v17 = vpop.f32.mrb[23].mxu1 }
 0x684   :  { %v1748_v19 = vpop.f32.mrb[24].mxu1 }
 0x685   :  { %v2262_v18 = vrot.slane %v1748_v19, 7  ;;  %v2990_v20 = vpop.f32.mrb[25].mxu1 }
 0x687   :  { %v2263_v21 = vsel %vm1487_vm3, %v2262_v18, %v1675_v15 }
 0x688   :  { %v1821_v22 = vpop.f32.mrb[26].mxu1 }
 0x689   :  { %v2264_v23 = vrot.slane %v1821_v22, 6  ;;  %v2995_v24 = vpop.f32.mrb[27].mxu1 }
 0x68b   :  { %v2265_v25 = vsel %vm1490_vm4, %v2264_v23, %v2263_v21 }
 0x68c   :  { %v1894_v26 = vpop.f32.mrb[28].mxu1 }
 0x68d   :  { %v2266_v28 = vrot.slane %v1894_v26, 5  ;;  %v3000_v7 = vpop.f32.mrb[29].mxu1 }
 0x68f   :  { %v2267_v27 = vsel %vm1493_vm5, %v2266_v28, %v2265_v25 }
 0x690   :  { %v1967_v29 = vpop.f32.mrb[30].mxu1 }
 0x691   :  { %v2268_v30 = vrot.slane %v1967_v29, 4  ;;  %v3005_v31 = vpop.f32.mrb[31].mxu1 }
 0x693   :  { %v2269_v32 = vsel %vm1496_vm6, %v2268_v30, %v2267_v27 }
 0x694   :  { %v2040_v33 = vpop.f32.mrb[32].mxu1 }
 0x695   :  { %v2270_v34 = vrot.slane %v2040_v33, 3  ;;  %v3010_v35 = vpop.f32.mrb[33].mxu1 }
 0x697   :  { %v2271_v36 = vsel %vm1499_vm7, %v2270_v34, %v2269_v32 }
 0x698   :  { %v2113_v37 = vpop.f32.mrb[34].mxu1 }
 0x699   :  { %v2272_v38 = vrot.slane %v2113_v37, 2  ;;  %v3015_v39 = vpop.f32.mrb[35].mxu1 }
 0x69b   :  { %v2273_v41 = vsel %vm1502_vm8, %v2272_v38, %v2271_v36 }
 0x69c   :  { %v2186_v42 = vpop.f32.mrb[36].mxu1 }
 0x69d   :  { %v2274_v43 = vrot.slane %v2186_v42, 1  ;;  %v3020_v44 = vpop.f32.mrb[37].mxu1 }
 0x69f   :  { %v2275_v46 = vsel %vm1505_vm9, %v2274_v43, %v2273_v41 }
 0x6a0   :  { %3054 = vmatmul.mubr.f32.vlgmr.msra.gmra.mrb[10].mxu0 %v2275_v46 }
 0x6a1   :  { %3232 = vmatpush3.bf16.msra.mxu0 %v2696_v45  ;;  %3123 = vmatprep.mubr.msk.f32.mxu0 %vm3781_vm0, %v3780_v1  ;;  %v2745_v1 = vld [vmem:[#allocation20 + $0x28] sm:$0xff]  }
 0x6a2   :  { %3233 = vmatprep.subr.bf16.mxu0 %v3783_v40 }
 0x6a5   :  { %3235 = vmatpush3.bf16.msra.mxu0 %v2741_v47 }
 0x6a6   :  { %3236 = vmatprep.subr.bf16.mxu0 %v3783_v40 }
 0x6a9   :  { %3238 = vmatpush3.bf16.msra.mxu0 %v2742_v48 }
 0x6aa   :  { %3239 = vmatprep.subr.bf16.mxu0 %v3783_v40 }
 0x6ad   :  { %3241 = vmatpush3.bf16.msra.mxu0 %v2743_v49 }
 0x6ae   :  { %3242 = vmatprep.subr.bf16.mxu0 %v3783_v40 }
 0x6b1   :  { %3244 = vmatpush3.bf16.msra.mxu0 %v2744_v52 }
 0x6b2   :  { %3245 = vmatprep.subr.bf16.mxu0 %v3783_v40 }
 0x6b5   :  { %3247 = vmatpush3.bf16.msra.mxu0 %v2745_v1 }
 0x6b6   :  { %3248 = vmatprep.subr.bf16.mxu0 %v3783_v40 }
 0x6b9   :  { %3250 = vmatpush3.bf16.msra.mxu0 %v2746_v62 }
 0x6ba   :  { %3251 = vmatprep.subr.bf16.mxu0 %v3783_v40 }
 0x6bc   :  { %v2413_v50 = vpop.f32.mrb[38].mxu1 }
 0x6bd   :  { %v3090_v51 = vpop.f32.mrb[39].mxu1  ;;  %3253 = vmatpush3.bf16.msra.mxu0 %v2747_v53 }
 0x773   :  { %v2343_v2 = vpop.f32.mrb[10].mxu0 }
 0x774   :  { %v2414_v4 = vadd.f32 %v2413_v50, %v2343_v2  ;;  %v3055_v55 = vpop.f32.mrb[11].mxu0 }
 0x776   :  { %v2424_v8 = vadd.f32 %v2629_v54, %v2414_v4 }
 0x778   :  { %3406 = vtanh.f32 %v2424_v8 }
 0x782   :  { %v3407_v56 = vpop.eup %3406 }
 0x783   :  { %3124 = vmatmul.mubr.f32.vlgmr.msra.gmra.mrb[12].mxu0 %v3407_v56 }
 0x856   :  { %v2531_v57 = vpop.f32.mrb[12].mxu0 }
 0x857   :  { %v2532_v14 = vadd.f32 %v2630_v11, %v2531_v57  ;;  %v3125_v16 = vpop.f32.mrb[13].mxu0 }
 0x859   :  { %2535 = vmax.xlane.f32.xlu1 %v2532_v14 }
 0x8e6   :  { %v2536_v58 = vpop.xlane.xlu1 %2535 }
 0x8e7   :  { %v2537_v60 = vsub.f32 %v2532_v14, %v2536_v58 }
 0x8e9   :  { %v2538_v61 = vmul.f32 1.442695, %v2537_v60 }
 0x8eb   :  { %3408 = vpow2.f32 %v2538_v61 }
 0x8f5   :  { %v3409_v40 = vpop.eup %3408 }
 0x8f6   :  { %2540 = vadd.xlane.f32.xlu1 %v3409_v40 }
 0x8f7   :  { %3709 = shalt.err (!%p3706_p10)
}
 0x8f8   :  { %s3710_s5 = scalar_lea.hbm %s4289_s14, 128 }
 0x8f9   :  { %p3711_p11 = scmp.ne.s32.totalorder %s4289_s14, %s3710_s5  ;;  %p3714_p12 = scmp.lt.u32.totalorder %s3710_s5, %s4289_s14 }
 0x8fb   :  { %p3716_p13 = pnand %p3714_p12, %p3711_p11 }
 0x8fd   :  { %3719 = shalt.err (!%p3716_p13)
}
 0x8fe   :  { %2568 = dma.vmem_to_hbm [thread:$0]  %s2566_s18, 128, %s4289_s14, [#allocation25]  }
 0x8ff   :  { %s3786_s23 = smov [#allocation23]  }
 0x900   :  { %s2555_s4 = sshll.u32 %s3786_s23, 4  ;;  %s2556_s4 = int_to_ptr.vmem [resolvable:$true] %s2555_s4 }
 0x901   :  { %s3720_s8 = scalar_lea.vmem %s2556_s4, 128  ;;  %p3725_p1 = scmp.lt.s32.totalorder %s2556_s4, %s2556_s4 }
 0x902   :  { %p3721_p0 = scmp.ne.s32.totalorder %s2556_s4, %s3720_s8  ;;  %p3726_p2 = scmp.lt.s32.totalorder %s3720_s8, %s3720_s8 }
 0x904   :  { %p3727_p3 = por %p3726_p2, %p3725_p1 }
 0x906   :  { %p3728_p4 = pnand %p3727_p3, %p3721_p0 }
 0x983   :  { %v2541_v63 = vpop.xlane.xlu1 %2540 }
 0x984   :  { %3410 = vrcp.f32 %v2541_v63 }
 0x98e   :  { %v3411_v0 = vpop.eup %3410 }
 0x98f   :  { %v2543_v3 = vmul.f32 %v3411_v0, %v2541_v63 }
 0x991   :  { %v2544_v5 = vsub.f32 2.0, %v2543_v3 }
 0x993   :  { %v2545_v6 = vmul.f32 %v3411_v0, %v2544_v5 }
 0x995   :  { %v2546_v9 = vmul.f32 %v3409_v40, %v2545_v6 }
 0x997   :  { %2547 = vst [vmem:[#allocation23] sm:$0xff] %v2546_v9 }
 0x998   :  { %3731 = shalt.err (!%p3728_p4)
}
 0x999   :  { %s3732_s30 = scalar_lea.hbm %s4288_s13, 128 }
 0x99a   :  { %p3733_p5 = scmp.ne.s32.totalorder %s4288_s13, %s3732_s30  ;;  %p3736_p6 = scmp.lt.u32.totalorder %s3732_s30, %s4288_s13 }
 0x99c   :  { %p3738_p7 = pnand %p3736_p6, %p3733_p5 }
 0x99e   :  { %3741 = shalt.err (!%p3738_p7)
}
 0x99f   :  { %2558 = dma.vmem_to_hbm [thread:$0]  %s2556_s4, 128, %s4288_s13, [#allocation4]  }
 0x9a0   :  { %3756 = dma.done.wait [#allocation4], 128  }
 0x9a1   :  { %3757 = vsyncadd [#allocation4], 4294967168 }
 0x9a2   :  { %3758 = dma.done.wait [#allocation25], 128  }
 0x9a3   :  { %3759 = vsyncadd [#allocation25], 4294967168 }
 0x9a4   :  { %2575 = vsyncpa [#allocation3], 1 }
 0x9a5   :  { %2576 = vsyncpa [#allocation6], 1 }
 0x9a6   :  { %2577 = vsyncpa [#allocation9], 1 }
 0x9a7   :  { %2578 = vsyncpa [#allocation12], 1 }
 0x9a8   :  { %2579 = vsyncpa [#allocation15], 1 }
 0x9a9   :  { %2580 = vsyncpa [#allocation18], 1 }
 0x9aa   :  { %2581 = vsyncpa [#allocation21], 1 }
 0x9ab   :  { %2582 = vsyncpa [#allocation4], 1 }
 0x9ac   :  { %2583 = vsyncpa [#allocation25], 1 }

</bundles_post_ra>
